<compile_context>
chip_gen: v7x
topology: tpu7x:2x2x1
jax: 0.10.0
libtpu: 0.0.40
codegen_flags: <defaults>
</compile_context>

<pallas_src>
import functools
import math

import jax
import jax.numpy as jnp
import numpy as np
from jax.experimental import pallas as pl
from jax.experimental.pallas import tpu as pltpu


def _layernorm(y, gamma, beta, eps=1e-5):
    mu = jnp.mean(y, axis=-1, keepdims=True)
    var = jnp.mean((y - mu) ** 2, axis=-1, keepdims=True)
    return (y - mu) * jax.lax.rsqrt(var + eps) * gamma + beta


def _gelu_exact(y):
    # nn.GELU() default = exact (erf) GELU
    return 0.5 * y * (1.0 + jax.lax.erf(y * (1.0 / math.sqrt(2.0))))


# ----------------------- pass 1: K^T / V projection (head-major) --------------
def kv_proj_kernel(x_ref, wk_ref, bk_ref, wv_ref, bv_ref, kt_ref, v_ref,
                   *, n_head: int):
    hd = kt_ref.shape[1]
    xb = x_ref[...].astype(jnp.bfloat16)                       # (tkv, E)
    for h in range(n_head):
        lo, hi = h * hd, (h + 1) * hd
        kh = jnp.dot(xb, wk_ref[:, lo:hi],
                     preferred_element_type=jnp.float32) + bk_ref[:, lo:hi]
        vh = jnp.dot(xb, wv_ref[:, lo:hi],
                     preferred_element_type=jnp.float32) + bv_ref[:, lo:hi]
        # K stored pre-transposed (hd, tkv); done once here, amortized over all
        # query tiles in pass 2.
        kt_ref[h, :, :] = kh.astype(jnp.bfloat16).T
        v_ref[h, :, :] = vh.astype(jnp.bfloat16)


# ------------ pass 2: Q proj + attention + out-proj + LN1 + FFN + LN2 ---------
def block_kernel(x_ref, kt_ref, v_ref,
                 wq_ref, bq_ref, wout_ref, bout_ref,
                 w1_ref, b1_ref, w2_ref, b2_ref,
                 g1_ref, be1_ref, g2_ref, be2_ref,
                 o_ref,
                 ffn_acc,
                 *, n_head: int, ffn_chunk: int):
    x = x_ref[...]                       # (tq, E) f32 residual stream
    xb = x.astype(jnp.bfloat16)
    E = x.shape[-1]
    hd = E // n_head
    scale = 1.0 / math.sqrt(hd)

    # residual + out-proj bias folded into the attention accumulator init.
    acc = x + bout_ref[...]              # (tq, E) f32

    for h in range(n_head):
        lo, hi = h * hd, (h + 1) * hd
        # Q projection for this head (contraction depth E), scale folded in.
        qh = jnp.dot(xb, wq_ref[:, lo:hi], preferred_element_type=jnp.float32)
        qh = ((qh + bq_ref[:, lo:hi]) * scale).astype(jnp.bfloat16)   # (tq, hd)

        khT = kt_ref[h]                  # (hd, S) bf16  (pre-transposed)
        vh = v_ref[h]                    # (S, hd) bf16

        s = jnp.dot(qh, khT, preferred_element_type=jnp.float32)     # (tq, S)
        m = jnp.max(s, axis=-1, keepdims=True)
        p = jnp.exp(s - m)                                            # un-normalized
        l = jnp.sum(p, axis=-1, keepdims=True)                        # (tq, 1)
        oh = jnp.dot(p.astype(jnp.bfloat16), vh,
                     preferred_element_type=jnp.float32)              # (tq, hd)
        # softmax normalization folded into the small head output (exact recip:
        # only (tq, 1) elements, negligible cost).
        oh = oh * pl.reciprocal(l, approx=False)

        # per-head output projection accumulation -> no (tq, E) attention slab.
        acc = acc + jnp.dot(oh.astype(jnp.bfloat16), wout_ref[lo:hi, :],
                            preferred_element_type=jnp.float32)

    # dropout == identity (eval mode)
    x1 = _layernorm(acc, g1_ref[...], be1_ref[...])                   # (tq, E) f32

    # ---- FFN with hidden-dim chunking; residual + bias2 folded into the acc --
    x1b = x1.astype(jnp.bfloat16)
    F4 = w1_ref.shape[-1]
    ffn_acc[...] = x1 + b2_ref[...]
    for c0 in range(0, F4, ffn_chunk):
        c1 = c0 + ffn_chunk
        h1 = jnp.dot(x1b, w1_ref[:, c0:c1],
                     preferred_element_type=jnp.float32) + b1_ref[:, c0:c1]
        h1 = _gelu_exact(h1).astype(jnp.bfloat16)
        ffn_acc[...] += jnp.dot(h1, w2_ref[c0:c1, :],
                                preferred_element_type=jnp.float32)
    # dropout == identity (eval mode)
    o_ref[...] = _layernorm(ffn_acc[...], g2_ref[...], be2_ref[...]).astype(o_ref.dtype)


# --------------------------- VMEM budgeting helpers ----------------------------
def _tpu_vmem_capacity_bytes():
    try:
        info = pltpu.get_tpu_info()
        cap = getattr(info, "vmem_capacity_bytes", None)
        if cap:
            return int(cap)
    except Exception:
        pass
    return 64 << 20        # assume the smallest generation (v7x) if query fails


def _estimate_vmem_bytes(S, E, tq, ffn_chunk, single_buffer):
    f32, bf16 = 4, 2
    F4 = 4 * E
    wbuf = 1 if single_buffer else 2
    weights = (E * E + E * E + E * F4 + F4 * E) * bf16 * wbuf   # wq, wout, w1, w2
    vectors = (2 * E + F4 + E + 4 * E) * f32 * wbuf             # biases + LN params
    kv = 2 * S * E * bf16 * 2                                   # K^T, V (double buffered)
    io = tq * E * f32 * 2 * 2                                   # x tile + out tile (dbl buf)
    acc = tq * E * f32 * 2                                      # attn accumulator + ffn_acc
    inter = 3 * tq * S * f32 + 3 * tq * ffn_chunk * f32         # scores / ffn chunk temps
    return weights + vectors + kv + io + acc + inter


def _fit_tiles(S, E, tq, ffn_chunk, capacity, single_buffer):
    budget = int(capacity * 0.85)
    while _estimate_vmem_bytes(S, E, tq, ffn_chunk, single_buffer) > budget:
        if ffn_chunk > 512:
            ffn_chunk //= 2
        elif tq > 64 and S % (tq // 2) == 0:
            tq //= 2
        elif ffn_chunk > 128:
            ffn_chunk //= 2
        else:
            break
    return tq, ffn_chunk


# --------------------------------- wrapper -------------------------------------
def _transformer_block(x, params, n_head, *, tq, ffn_chunk, single_buffer_invariants):
    B, S, E = x.shape
    H = n_head
    hd = E // H
    F4 = 4 * E
    bf = jnp.bfloat16

    # Tiling.  Prod shapes should satisfy tq % 128 == 0 and E % 128 == 0
    # (ideally hd a multiple of 128 for full MXU fill on v6e/v7x); the demo
    # fallback below uses a single full-sequence tile.
    tq = min(tq, S)
    if S % tq != 0:
        tq = S
    ffn_chunk = min(ffn_chunk, F4)
    if F4 % ffn_chunk != 0:
        ffn_chunk = F4

    capacity = _tpu_vmem_capacity_bytes()
    tq, ffn_chunk = _fit_tiles(S, E, tq, ffn_chunk, capacity, single_buffer_invariants)
    n_q = S // tq
    tkv = tq if (tq % 128 == 0 or tq == S) else S
    n_kv = S // tkv

    est = _estimate_vmem_bytes(S, E, tq, ffn_chunk, single_buffer_invariants)
    vmem_limit = min(capacity - (4 << 20), max(32 << 20, int(1.4 * est) + (8 << 20)))

    # Split packed qkv parameters; Q weights go to pass 2 only.
    wq = params["wqkv"][:, :E].astype(bf)
    wk = params["wqkv"][:, E:2 * E].astype(bf)
    wv = params["wqkv"][:, 2 * E:].astype(bf)
    bq = params["bqkv"][:, :E]
    bk = params["bqkv"][:, E:2 * E]
    bv = params["bqkv"][:, 2 * E:]
    wout = params["wout"].astype(bf)
    w1 = params["w1"].astype(bf)
    w2 = params["w2"].astype(bf)

    def inv_spec(shape, index_map):
        # Grid-invariant block (constant index_map): single-buffer it so the
        # pipeline does not allocate a useless second VMEM copy.
        if single_buffer_invariants:
            return pl.BlockSpec(shape, index_map, pipeline_mode=pl.Buffered(1))
        return pl.BlockSpec(shape, index_map)

    # ----------------------- pass 1: K^T / V projection -----------------------
    kv_cparams = pltpu.CompilerParams(
        dimension_semantics=("parallel", "parallel"),
        vmem_limit_bytes=vmem_limit,
    )
    x_kv_spec = pl.BlockSpec((pl.Squeezed(), tkv, E), lambda b, i: (b, i, 0))
    kt, v = pl.pallas_call(
        functools.partial(kv_proj_kernel, n_head=H),
        out_shape=(jax.ShapeDtypeStruct((B, H, hd, S), bf),
                   jax.ShapeDtypeStruct((B, H, S, hd), bf)),
        grid_spec=pltpu.PrefetchScalarGridSpec(
            num_scalar_prefetch=0,
            grid=(B, n_kv),
            in_specs=[
                x_kv_spec,
                inv_spec((E, E), lambda b, i: (0, 0)),
                inv_spec((1, E), lambda b, i: (0, 0)),
                inv_spec((E, E), lambda b, i: (0, 0)),
                inv_spec((1, E), lambda b, i: (0, 0)),
            ],
            out_specs=[
                pl.BlockSpec((pl.Squeezed(), H, hd, tkv), lambda b, i: (b, 0, 0, i)),
                pl.BlockSpec((pl.Squeezed(), H, tkv, hd), lambda b, i: (b, 0, i, 0)),
            ],
        ),
        compiler_params=kv_cparams,
    )(x, wk, bk, wv, bv)

    # ---------------- pass 2: fused attention + out-proj + FFN ----------------
    # Batch axis "parallel" (v7x TCs shard on batch, K/V fetched once per
    # batch per core), query-tile axis "arbitrary".
    blk_cparams = pltpu.CompilerParams(
        dimension_semantics=("parallel", "arbitrary"),
        vmem_limit_bytes=vmem_limit,
    )
    x_q_spec = pl.BlockSpec((pl.Squeezed(), tq, E), lambda b, i: (b, i, 0))
    param_list = [wq, bq, wout, params["bout"], w1, params["b1"], w2, params["b2"],
                  params["g1"], params["be1"], params["g2"], params["be2"]]
    param_specs = [inv_spec(p.shape, lambda b, i: (0, 0)) for p in param_list]

    out = pl.pallas_call(
        functools.partial(block_kernel, n_head=H, ffn_chunk=ffn_chunk),
        out_shape=jax.ShapeDtypeStruct((B, S, E), x.dtype),
        grid_spec=pltpu.PrefetchScalarGridSpec(
            num_scalar_prefetch=0,
            grid=(B, n_q),
            in_specs=[
                x_q_spec,
                pl.BlockSpec((pl.Squeezed(), H, hd, S), lambda b, i: (b, 0, 0, 0)),
                pl.BlockSpec((pl.Squeezed(), H, S, hd), lambda b, i: (b, 0, 0, 0)),
            ] + param_specs,
            out_specs=x_q_spec,
            scratch_shapes=[pltpu.VMEM((tq, E), jnp.float32)],   # FFN accumulator
        ),
        compiler_params=blk_cparams,
    )(x, kt, v, *param_list)
    return out


def transformer_block(x, params, n_head, *, tq=256, ffn_chunk=1024):
    """x: (B, S, E) float32; params: dict of f32 arrays (Linear weights (in, out))."""
    try:
        return _transformer_block(x, params, n_head, tq=tq, ffn_chunk=ffn_chunk,
                                  single_buffer_invariants=True)
    except Exception:
        # pipeline_mode=pl.Buffered(1) not supported by this jax version:
        # fall back to default double-buffering (correct, just more VMEM).
        return _transformer_block(x, params, n_head, tq=tq, ffn_chunk=ffn_chunk,
                                  single_buffer_invariants=False)


def init_params(key, E):
    """Deterministic synthetic parameters (Linear weights stored as (in, out))."""
    ks = jax.random.split(key, 6)
    s = 0.02
    return {
        "wqkv": s * jax.random.normal(ks[0], (E, 3 * E), jnp.float32),
        "bqkv": s * jax.random.normal(ks[1], (1, 3 * E), jnp.float32),
        "wout": s * jax.random.normal(ks[2], (E, E), jnp.float32),
        "bout": s * jax.random.normal(ks[3], (1, E), jnp.float32),
        "w1":   s * jax.random.normal(ks[4], (E, 4 * E), jnp.float32),
        "b1":   jnp.zeros((1, 4 * E), jnp.float32),
        "w2":   s * jax.random.normal(ks[5], (4 * E, E), jnp.float32),
        "b2":   jnp.zeros((1, E), jnp.float32),
        "g1":   jnp.ones((1, E), jnp.float32),
        "be1":  jnp.zeros((1, E), jnp.float32),
        "g2":   jnp.ones((1, E), jnp.float32),
        "be2":  jnp.zeros((1, E), jnp.float32),
    }


def reference_jax(x, p, n_head):
    """Pure-JAX f32 reference mirroring the PyTorch forward (dropout = identity)."""
    B, S, E = x.shape
    hd = E // n_head
    qkv = x @ p["wqkv"] + p["bqkv"][0]
    q, k, v = jnp.split(qkv, 3, axis=-1)
    q = q.reshape(B, S, n_head, hd).transpose(0, 2, 1, 3)
    k = k.reshape(B, S, n_head, hd).transpose(0, 2, 1, 3)
    v = v.reshape(B, S, n_head, hd).transpose(0, 2, 1, 3)
    s = jnp.einsum("bhqd,bhkd->bhqk", q, k) / math.sqrt(hd)
    w = jax.nn.softmax(s, axis=-1)
    a = jnp.einsum("bhqk,bhkd->bhqd", w, v).transpose(0, 2, 1, 3).reshape(B, S, E)
    a = a @ p["wout"] + p["bout"][0]

    def ln(y, g, b):
        mu = jnp.mean(y, -1, keepdims=True)
        var = jnp.mean((y - mu) ** 2, -1, keepdims=True)
        return (y - mu) / jnp.sqrt(var + 1e-5) * g + b

    x1 = ln(x + a, p["g1"][0], p["be1"][0])
    h = jax.nn.gelu(x1 @ p["w1"] + p["b1"][0], approximate=False)
    h = h @ p["w2"] + p["b2"][0]
    return ln(x1 + h, p["g2"][0], p["be2"][0])


if __name__ == "__main__":
    B, S, E, H = 2, 8, 32, 4     # small demo shapes; prod: E (and hd) multiples of 128

    key = jax.random.PRNGKey(0)
    k_x, k_p = jax.random.split(key)
    x = jax.random.normal(k_x, (B, S, E), jnp.float32)
    params = init_params(k_p, E)

    out = transformer_block(x, params, n_head=H)
    out = jax.block_until_ready(out)

    ref = reference_jax(x, params, H)
    assert out.shape == (B, S, E)
    # Kernel matmuls run in bf16 (f32 accumulation); compare with a loose tol.
    assert np.allclose(np.asarray(out), np.asarray(ref), atol=2e-2, rtol=2e-2), (
        "Pallas output differs from JAX reference"
    )
    print("KERNEL_OK")
</pallas_src>

<mosaic_0001>
module attributes {stable_mosaic.version = 11 : i64} {
  func.func @kv_proj_kernel(%arg0: i32, %arg1: i32, %arg2: memref<1x8x32xf32, #tpu.memory_space<vmem>>, %arg3: memref<32x32xbf16, #tpu.memory_space<vmem>>, %arg4: memref<1x32xf32, #tpu.memory_space<vmem>>, %arg5: memref<32x32xbf16, #tpu.memory_space<vmem>>, %arg6: memref<1x32xf32, #tpu.memory_space<vmem>>, %arg7: memref<1x4x8x8xbf16, #tpu.memory_space<vmem>>, %arg8: memref<1x4x8x8xbf16, #tpu.memory_space<vmem>>) attributes {dimension_semantics = [#tpu.dimension_semantics<parallel>, #tpu.dimension_semantics<parallel>], iteration_bounds = array<i64: 2, 1>, scalar_prefetch = 0 : i64, scratch_operands = 0 : i64, tpu.core_type = #tpu.core_type<tc>, window_params = [{transform_indices = @transform_0, window_bounds = array<i64: 1, 8, 32>}, {pipeline_mode = #tpu.pipeline_mode<synchronous>, transform_indices = @transform_1, window_bounds = array<i64: 32, 32>}, {pipeline_mode = #tpu.pipeline_mode<synchronous>, transform_indices = @transform_2, window_bounds = array<i64: 1, 32>}, {pipeline_mode = #tpu.pipeline_mode<synchronous>, transform_indices = @transform_3, window_bounds = array<i64: 32, 32>}, {pipeline_mode = #tpu.pipeline_mode<synchronous>, transform_indices = @transform_4, window_bounds = array<i64: 1, 32>}, {transform_indices = @transform_5, window_bounds = array<i64: 1, 4, 8, 8>}, {transform_indices = @transform_6, window_bounds = array<i64: 1, 4, 8, 8>}]} {
    %c0 = arith.constant 0 : index
    %c0_0 = arith.constant 0 : index
    %c0_1 = arith.constant 0 : index
    %0 = vector.load %arg2[%c0, %c0_0, %c0_1] : memref<1x8x32xf32, #tpu.memory_space<vmem>>, vector<1x8x32xf32>
    %1 = vector.shape_cast %0 : vector<1x8x32xf32> to vector<8x32xf32>
    %2 = arith.truncf %1 : vector<8x32xf32> to vector<8x32xbf16>
    %c0_2 = arith.constant 0 : index
    %c0_3 = arith.constant 0 : index
    %3 = vector.load %arg3[%c0_2, %c0_3] : memref<32x32xbf16, #tpu.memory_space<vmem>>, vector<32x8xbf16>
    %cst = arith.constant dense<0.000000e+00> : vector<8x8xf32>
    %4 = tpu.matmul %2, %3, %cst {dimension_numbers = #tpu.dot_dimension_numbers<[1], [0], [0], [1], [0, 0, 1, 1], [], []>} : vector<8x32xbf16>, vector<32x8xbf16>, vector<8x8xf32> -> vector<8x8xf32>
    %c0_4 = arith.constant 0 : index
    %c0_5 = arith.constant 0 : index
    %5 = vector.load %arg4[%c0_4, %c0_5] : memref<1x32xf32, #tpu.memory_space<vmem>>, vector<1x8xf32>
    %6 = vector.broadcast %5 : vector<1x8xf32> to vector<8x8xf32>
    %7 = arith.addf %4, %6 : vector<8x8xf32>
    %c0_6 = arith.constant 0 : index
    %c0_7 = arith.constant 0 : index
    %8 = vector.load %arg5[%c0_6, %c0_7] : memref<32x32xbf16, #tpu.memory_space<vmem>>, vector<32x8xbf16>
    %cst_8 = arith.constant dense<0.000000e+00> : vector<8x8xf32>
    %9 = tpu.matmul %2, %8, %cst_8 {dimension_numbers = #tpu.dot_dimension_numbers<[1], [0], [0], [1], [0, 0, 1, 1], [], []>} : vector<8x32xbf16>, vector<32x8xbf16>, vector<8x8xf32> -> vector<8x8xf32>
    %c0_9 = arith.constant 0 : index
    %c0_10 = arith.constant 0 : index
    %10 = vector.load %arg6[%c0_9, %c0_10] : memref<1x32xf32, #tpu.memory_space<vmem>>, vector<1x8xf32>
    %11 = vector.broadcast %10 : vector<1x8xf32> to vector<8x8xf32>
    %12 = arith.addf %9, %11 : vector<8x8xf32>
    %13 = arith.truncf %7 : vector<8x8xf32> to vector<8x8xbf16>
    %14 = tpu.transpose %13, [1, 0] : vector<8x8xbf16> -> vector<8x8xbf16>
    %c0_11 = arith.constant 0 : index
    %c0_12 = arith.constant 0 : index
    %c0_13 = arith.constant 0 : index
    %c0_14 = arith.constant 0 : index
    %15 = vector.load %arg7[%c0_11, %c0_12, %c0_13, %c0_14] : memref<1x4x8x8xbf16, #tpu.memory_space<vmem>>, vector<1x1x8x8xbf16>
    %16 = vector.shape_cast %15 : vector<1x1x8x8xbf16> to vector<8x8xbf16>
    %17 = vector.shape_cast %14 : vector<8x8xbf16> to vector<1x1x8x8xbf16>
    tpu.vector_store %arg7[%c0_11, %c0_12, %c0_13, %c0_14], %17 {strides = array<i32>} : memref<1x4x8x8xbf16, #tpu.memory_space<vmem>>, vector<1x1x8x8xbf16>,
    %18 = arith.truncf %12 : vector<8x8xf32> to vector<8x8xbf16>
    %c0_15 = arith.constant 0 : index
    %c0_16 = arith.constant 0 : index
    %c0_17 = arith.constant 0 : index
    %c0_18 = arith.constant 0 : index
    %19 = vector.load %arg8[%c0_15, %c0_16, %c0_17, %c0_18] : memref<1x4x8x8xbf16, #tpu.memory_space<vmem>>, vector<1x1x8x8xbf16>
    %20 = vector.shape_cast %19 : vector<1x1x8x8xbf16> to vector<8x8xbf16>
    %21 = vector.shape_cast %18 : vector<8x8xbf16> to vector<1x1x8x8xbf16>
    tpu.vector_store %arg8[%c0_15, %c0_16, %c0_17, %c0_18], %21 {strides = array<i32>} : memref<1x4x8x8xbf16, #tpu.memory_space<vmem>>, vector<1x1x8x8xbf16>,
    %c0_19 = arith.constant 0 : index
    %c8 = arith.constant 8 : index
    %22 = vector.load %arg3[%c0_19, %c8] : memref<32x32xbf16, #tpu.memory_space<vmem>>, vector<32x8xbf16>
    %cst_20 = arith.constant dense<0.000000e+00> : vector<8x8xf32>
    %23 = tpu.matmul %2, %22, %cst_20 {dimension_numbers = #tpu.dot_dimension_numbers<[1], [0], [0], [1], [0, 0, 1, 1], [], []>} : vector<8x32xbf16>, vector<32x8xbf16>, vector<8x8xf32> -> vector<8x8xf32>
    %c0_21 = arith.constant 0 : index
    %c8_22 = arith.constant 8 : index
    %24 = vector.load %arg4[%c0_21, %c8_22] : memref<1x32xf32, #tpu.memory_space<vmem>>, vector<1x8xf32>
    %25 = vector.broadcast %24 : vector<1x8xf32> to vector<8x8xf32>
    %26 = arith.addf %23, %25 : vector<8x8xf32>
    %c0_23 = arith.constant 0 : index
    %c8_24 = arith.constant 8 : index
    %27 = vector.load %arg5[%c0_23, %c8_24] : memref<32x32xbf16, #tpu.memory_space<vmem>>, vector<32x8xbf16>
    %cst_25 = arith.constant dense<0.000000e+00> : vector<8x8xf32>
    %28 = tpu.matmul %2, %27, %cst_25 {dimension_numbers = #tpu.dot_dimension_numbers<[1], [0], [0], [1], [0, 0, 1, 1], [], []>} : vector<8x32xbf16>, vector<32x8xbf16>, vector<8x8xf32> -> vector<8x8xf32>
    %c0_26 = arith.constant 0 : index
    %c8_27 = arith.constant 8 : index
    %29 = vector.load %arg6[%c0_26, %c8_27] : memref<1x32xf32, #tpu.memory_space<vmem>>, vector<1x8xf32>
    %30 = vector.broadcast %29 : vector<1x8xf32> to vector<8x8xf32>
    %31 = arith.addf %28, %30 : vector<8x8xf32>
    %32 = arith.truncf %26 : vector<8x8xf32> to vector<8x8xbf16>
    %33 = tpu.transpose %32, [1, 0] : vector<8x8xbf16> -> vector<8x8xbf16>
    %c0_28 = arith.constant 0 : index
    %c1 = arith.constant 1 : index
    %c0_29 = arith.constant 0 : index
    %c0_30 = arith.constant 0 : index
    %34 = vector.load %arg7[%c0_28, %c1, %c0_29, %c0_30] : memref<1x4x8x8xbf16, #tpu.memory_space<vmem>>, vector<1x1x8x8xbf16>
    %35 = vector.shape_cast %34 : vector<1x1x8x8xbf16> to vector<8x8xbf16>
    %36 = vector.shape_cast %33 : vector<8x8xbf16> to vector<1x1x8x8xbf16>
    tpu.vector_store %arg7[%c0_28, %c1, %c0_29, %c0_30], %36 {strides = array<i32>} : memref<1x4x8x8xbf16, #tpu.memory_space<vmem>>, vector<1x1x8x8xbf16>,
    %37 = arith.truncf %31 : vector<8x8xf32> to vector<8x8xbf16>
    %c0_31 = arith.constant 0 : index
    %c1_32 = arith.constant 1 : index
    %c0_33 = arith.constant 0 : index
    %c0_34 = arith.constant 0 : index
    %38 = vector.load %arg8[%c0_31, %c1_32, %c0_33, %c0_34] : memref<1x4x8x8xbf16, #tpu.memory_space<vmem>>, vector<1x1x8x8xbf16>
    %39 = vector.shape_cast %38 : vector<1x1x8x8xbf16> to vector<8x8xbf16>
    %40 = vector.shape_cast %37 : vector<8x8xbf16> to vector<1x1x8x8xbf16>
    tpu.vector_store %arg8[%c0_31, %c1_32, %c0_33, %c0_34], %40 {strides = array<i32>} : memref<1x4x8x8xbf16, #tpu.memory_space<vmem>>, vector<1x1x8x8xbf16>,
    %c0_35 = arith.constant 0 : index
    %c16 = arith.constant 16 : index
    %41 = vector.load %arg3[%c0_35, %c16] : memref<32x32xbf16, #tpu.memory_space<vmem>>, vector<32x8xbf16>
    %cst_36 = arith.constant dense<0.000000e+00> : vector<8x8xf32>
    %42 = tpu.matmul %2, %41, %cst_36 {dimension_numbers = #tpu.dot_dimension_numbers<[1], [0], [0], [1], [0, 0, 1, 1], [], []>} : vector<8x32xbf16>, vector<32x8xbf16>, vector<8x8xf32> -> vector<8x8xf32>
    %c0_37 = arith.constant 0 : index
    %c16_38 = arith.constant 16 : index
    %43 = vector.load %arg4[%c0_37, %c16_38] : memref<1x32xf32, #tpu.memory_space<vmem>>, vector<1x8xf32>
    %44 = vector.broadcast %43 : vector<1x8xf32> to vector<8x8xf32>
    %45 = arith.addf %42, %44 : vector<8x8xf32>
    %c0_39 = arith.constant 0 : index
    %c16_40 = arith.constant 16 : index
    %46 = vector.load %arg5[%c0_39, %c16_40] : memref<32x32xbf16, #tpu.memory_space<vmem>>, vector<32x8xbf16>
    %cst_41 = arith.constant dense<0.000000e+00> : vector<8x8xf32>
    %47 = tpu.matmul %2, %46, %cst_41 {dimension_numbers = #tpu.dot_dimension_numbers<[1], [0], [0], [1], [0, 0, 1, 1], [], []>} : vector<8x32xbf16>, vector<32x8xbf16>, vector<8x8xf32> -> vector<8x8xf32>
    %c0_42 = arith.constant 0 : index
    %c16_43 = arith.constant 16 : index
    %48 = vector.load %arg6[%c0_42, %c16_43] : memref<1x32xf32, #tpu.memory_space<vmem>>, vector<1x8xf32>
    %49 = vector.broadcast %48 : vector<1x8xf32> to vector<8x8xf32>
    %50 = arith.addf %47, %49 : vector<8x8xf32>
    %51 = arith.truncf %45 : vector<8x8xf32> to vector<8x8xbf16>
    %52 = tpu.transpose %51, [1, 0] : vector<8x8xbf16> -> vector<8x8xbf16>
    %c0_44 = arith.constant 0 : index
    %c2 = arith.constant 2 : index
    %c0_45 = arith.constant 0 : index
    %c0_46 = arith.constant 0 : index
    %53 = vector.load %arg7[%c0_44, %c2, %c0_45, %c0_46] : memref<1x4x8x8xbf16, #tpu.memory_space<vmem>>, vector<1x1x8x8xbf16>
    %54 = vector.shape_cast %53 : vector<1x1x8x8xbf16> to vector<8x8xbf16>
    %55 = vector.shape_cast %52 : vector<8x8xbf16> to vector<1x1x8x8xbf16>
    tpu.vector_store %arg7[%c0_44, %c2, %c0_45, %c0_46], %55 {strides = array<i32>} : memref<1x4x8x8xbf16, #tpu.memory_space<vmem>>, vector<1x1x8x8xbf16>,
    %56 = arith.truncf %50 : vector<8x8xf32> to vector<8x8xbf16>
    %c0_47 = arith.constant 0 : index
    %c2_48 = arith.constant 2 : index
    %c0_49 = arith.constant 0 : index
    %c0_50 = arith.constant 0 : index
    %57 = vector.load %arg8[%c0_47, %c2_48, %c0_49, %c0_50] : memref<1x4x8x8xbf16, #tpu.memory_space<vmem>>, vector<1x1x8x8xbf16>
    %58 = vector.shape_cast %57 : vector<1x1x8x8xbf16> to vector<8x8xbf16>
    %59 = vector.shape_cast %56 : vector<8x8xbf16> to vector<1x1x8x8xbf16>
    tpu.vector_store %arg8[%c0_47, %c2_48, %c0_49, %c0_50], %59 {strides = array<i32>} : memref<1x4x8x8xbf16, #tpu.memory_space<vmem>>, vector<1x1x8x8xbf16>,
    %c0_51 = arith.constant 0 : index
    %c24 = arith.constant 24 : index
    %60 = vector.load %arg3[%c0_51, %c24] : memref<32x32xbf16, #tpu.memory_space<vmem>>, vector<32x8xbf16>
    %cst_52 = arith.constant dense<0.000000e+00> : vector<8x8xf32>
    %61 = tpu.matmul %2, %60, %cst_52 {dimension_numbers = #tpu.dot_dimension_numbers<[1], [0], [0], [1], [0, 0, 1, 1], [], []>} : vector<8x32xbf16>, vector<32x8xbf16>, vector<8x8xf32> -> vector<8x8xf32>
    %c0_53 = arith.constant 0 : index
    %c24_54 = arith.constant 24 : index
    %62 = vector.load %arg4[%c0_53, %c24_54] : memref<1x32xf32, #tpu.memory_space<vmem>>, vector<1x8xf32>
    %63 = vector.broadcast %62 : vector<1x8xf32> to vector<8x8xf32>
    %64 = arith.addf %61, %63 : vector<8x8xf32>
    %c0_55 = arith.constant 0 : index
    %c24_56 = arith.constant 24 : index
    %65 = vector.load %arg5[%c0_55, %c24_56] : memref<32x32xbf16, #tpu.memory_space<vmem>>, vector<32x8xbf16>
    %cst_57 = arith.constant dense<0.000000e+00> : vector<8x8xf32>
    %66 = tpu.matmul %2, %65, %cst_57 {dimension_numbers = #tpu.dot_dimension_numbers<[1], [0], [0], [1], [0, 0, 1, 1], [], []>} : vector<8x32xbf16>, vector<32x8xbf16>, vector<8x8xf32> -> vector<8x8xf32>
    %c0_58 = arith.constant 0 : index
    %c24_59 = arith.constant 24 : index
    %67 = vector.load %arg6[%c0_58, %c24_59] : memref<1x32xf32, #tpu.memory_space<vmem>>, vector<1x8xf32>
    %68 = vector.broadcast %67 : vector<1x8xf32> to vector<8x8xf32>
    %69 = arith.addf %66, %68 : vector<8x8xf32>
    %70 = arith.truncf %64 : vector<8x8xf32> to vector<8x8xbf16>
    %71 = tpu.transpose %70, [1, 0] : vector<8x8xbf16> -> vector<8x8xbf16>
    %c0_60 = arith.constant 0 : index
    %c3 = arith.constant 3 : index
    %c0_61 = arith.constant 0 : index
    %c0_62 = arith.constant 0 : index
    %72 = vector.load %arg7[%c0_60, %c3, %c0_61, %c0_62] : memref<1x4x8x8xbf16, #tpu.memory_space<vmem>>, vector<1x1x8x8xbf16>
    %73 = vector.shape_cast %72 : vector<1x1x8x8xbf16> to vector<8x8xbf16>
    %74 = vector.shape_cast %71 : vector<8x8xbf16> to vector<1x1x8x8xbf16>
    tpu.vector_store %arg7[%c0_60, %c3, %c0_61, %c0_62], %74 {strides = array<i32>} : memref<1x4x8x8xbf16, #tpu.memory_space<vmem>>, vector<1x1x8x8xbf16>,
    %75 = arith.truncf %69 : vector<8x8xf32> to vector<8x8xbf16>
    %c0_63 = arith.constant 0 : index
    %c3_64 = arith.constant 3 : index
    %c0_65 = arith.constant 0 : index
    %c0_66 = arith.constant 0 : index
    %76 = vector.load %arg8[%c0_63, %c3_64, %c0_65, %c0_66] : memref<1x4x8x8xbf16, #tpu.memory_space<vmem>>, vector<1x1x8x8xbf16>
    %77 = vector.shape_cast %76 : vector<1x1x8x8xbf16> to vector<8x8xbf16>
    %78 = vector.shape_cast %75 : vector<8x8xbf16> to vector<1x1x8x8xbf16>
    tpu.vector_store %arg8[%c0_63, %c3_64, %c0_65, %c0_66], %78 {strides = array<i32>} : memref<1x4x8x8xbf16, #tpu.memory_space<vmem>>, vector<1x1x8x8xbf16>,
    return
  }
  func.func @transform_0(%arg0: i32, %arg1: i32) -> (i32, i32, i32) {
    %c0_i32 = arith.constant 0 : i32
    %c0_i32_0 = arith.constant 0 : i32
    return %arg0, %arg1, %c0_i32 : i32, i32, i32
  }
  func.func @transform_1(%arg0: i32, %arg1: i32) -> (i32, i32) {
    %c0_i32 = arith.constant 0 : i32
    %c0_i32_0 = arith.constant 0 : i32
    %c0_i32_1 = arith.constant 0 : i32
    return %c0_i32, %c0_i32_0 : i32, i32
  }
  func.func @transform_2(%arg0: i32, %arg1: i32) -> (i32, i32) {
    %c0_i32 = arith.constant 0 : i32
    %c0_i32_0 = arith.constant 0 : i32
    %c0_i32_1 = arith.constant 0 : i32
    return %c0_i32, %c0_i32_0 : i32, i32
  }
  func.func @transform_3(%arg0: i32, %arg1: i32) -> (i32, i32) {
    %c0_i32 = arith.constant 0 : i32
    %c0_i32_0 = arith.constant 0 : i32
    %c0_i32_1 = arith.constant 0 : i32
    return %c0_i32, %c0_i32_0 : i32, i32
  }
  func.func @transform_4(%arg0: i32, %arg1: i32) -> (i32, i32) {
    %c0_i32 = arith.constant 0 : i32
    %c0_i32_0 = arith.constant 0 : i32
    %c0_i32_1 = arith.constant 0 : i32
    return %c0_i32, %c0_i32_0 : i32, i32
  }
  func.func @transform_5(%arg0: i32, %arg1: i32) -> (i32, i32, i32, i32) {
    %c0_i32 = arith.constant 0 : i32
    %c0_i32_0 = arith.constant 0 : i32
    %c0_i32_1 = arith.constant 0 : i32
    return %arg0, %c0_i32, %c0_i32_0, %arg1 : i32, i32, i32, i32
  }
  func.func @transform_6(%arg0: i32, %arg1: i32) -> (i32, i32, i32, i32) {
    %c0_i32 = arith.constant 0 : i32
    %c0_i32_0 = arith.constant 0 : i32
    %c0_i32_1 = arith.constant 0 : i32
    return %arg0, %c0_i32, %arg1, %c0_i32_0 : i32, i32, i32, i32
  }
}

module attributes {stable_mosaic.version = 11 : i64} {
  func.func @kv_proj_kernel(%arg0: i32, %arg1: i32, %arg2: memref<1x8x32xf32, #tpu.memory_space<vmem>>, %arg3: memref<32x32xbf16, #tpu.memory_space<vmem>>, %arg4: memref<1x32xf32, #tpu.memory_space<vmem>>, %arg5: memref<32x32xbf16, #tpu.memory_space<vmem>>, %arg6: memref<1x32xf32, #tpu.memory_space<vmem>>, %arg7: memref<1x4x8x8xbf16, #tpu.memory_space<vmem>>, %arg8: memref<1x4x8x8xbf16, #tpu.memory_space<vmem>>) attributes {dimension_semantics = [#tpu.dimension_semantics<parallel>, #tpu.dimension_semantics<parallel>], iteration_bounds = array<i64: 2, 1>, scalar_prefetch = 0 : i64, scratch_operands = 0 : i64, tpu.core_type = #tpu.core_type<tc>, window_params = [{transform_indices = @transform_0, window_bounds = array<i64: 1, 8, 32>}, {pipeline_mode = #tpu.pipeline_mode<synchronous>, transform_indices = @transform_1, window_bounds = array<i64: 32, 32>}, {pipeline_mode = #tpu.pipeline_mode<synchronous>, transform_indices = @transform_2, window_bounds = array<i64: 1, 32>}, {pipeline_mode = #tpu.pipeline_mode<synchronous>, transform_indices = @transform_3, window_bounds = array<i64: 32, 32>}, {pipeline_mode = #tpu.pipeline_mode<synchronous>, transform_indices = @transform_4, window_bounds = array<i64: 1, 32>}, {transform_indices = @transform_5, window_bounds = array<i64: 1, 4, 8, 8>}, {transform_indices = @transform_6, window_bounds = array<i64: 1, 4, 8, 8>}]} {
    %c0 = arith.constant 0 : index
    %c0_0 = arith.constant 0 : index
    %c0_1 = arith.constant 0 : index
    %0 = vector.load %arg2[%c0, %c0_0, %c0_1] : memref<1x8x32xf32, #tpu.memory_space<vmem>>, vector<1x8x32xf32>
    %1 = vector.shape_cast %0 : vector<1x8x32xf32> to vector<8x32xf32>
    %2 = arith.truncf %1 : vector<8x32xf32> to vector<8x32xbf16>
    %c0_2 = arith.constant 0 : index
    %c0_3 = arith.constant 0 : index
    %3 = vector.load %arg3[%c0_2, %c0_3] : memref<32x32xbf16, #tpu.memory_space<vmem>>, vector<32x8xbf16>
    %cst = arith.constant dense<0.000000e+00> : vector<8x8xf32>
    %4 = tpu.matmul %2, %3, %cst {dimension_numbers = #tpu.dot_dimension_numbers<[1], [0], [0], [1], [0, 0, 1, 1], [], []>} : vector<8x32xbf16>, vector<32x8xbf16>, vector<8x8xf32> -> vector<8x8xf32>
    %c0_4 = arith.constant 0 : index
    %c0_5 = arith.constant 0 : index
    %5 = vector.load %arg4[%c0_4, %c0_5] : memref<1x32xf32, #tpu.memory_space<vmem>>, vector<1x8xf32>
    %6 = vector.broadcast %5 : vector<1x8xf32> to vector<8x8xf32>
    %7 = arith.addf %4, %6 : vector<8x8xf32>
    %c0_6 = arith.constant 0 : index
    %c0_7 = arith.constant 0 : index
    %8 = vector.load %arg5[%c0_6, %c0_7] : memref<32x32xbf16, #tpu.memory_space<vmem>>, vector<32x8xbf16>
    %cst_8 = arith.constant dense<0.000000e+00> : vector<8x8xf32>
    %9 = tpu.matmul %2, %8, %cst_8 {dimension_numbers = #tpu.dot_dimension_numbers<[1], [0], [0], [1], [0, 0, 1, 1], [], []>} : vector<8x32xbf16>, vector<32x8xbf16>, vector<8x8xf32> -> vector<8x8xf32>
    %c0_9 = arith.constant 0 : index
    %c0_10 = arith.constant 0 : index
    %10 = vector.load %arg6[%c0_9, %c0_10] : memref<1x32xf32, #tpu.memory_space<vmem>>, vector<1x8xf32>
    %11 = vector.broadcast %10 : vector<1x8xf32> to vector<8x8xf32>
    %12 = arith.addf %9, %11 : vector<8x8xf32>
    %13 = arith.truncf %7 : vector<8x8xf32> to vector<8x8xbf16>
    %14 = tpu.transpose %13, [1, 0] : vector<8x8xbf16> -> vector<8x8xbf16>
    %c0_11 = arith.constant 0 : index
    %c0_12 = arith.constant 0 : index
    %c0_13 = arith.constant 0 : index
    %c0_14 = arith.constant 0 : index
    %15 = vector.load %arg7[%c0_11, %c0_12, %c0_13, %c0_14] : memref<1x4x8x8xbf16, #tpu.memory_space<vmem>>, vector<1x1x8x8xbf16>
    %16 = vector.shape_cast %15 : vector<1x1x8x8xbf16> to vector<8x8xbf16>
    %17 = vector.shape_cast %14 : vector<8x8xbf16> to vector<1x1x8x8xbf16>
    tpu.vector_store %arg7[%c0_11, %c0_12, %c0_13, %c0_14], %17 {strides = array<i32>} : memref<1x4x8x8xbf16, #tpu.memory_space<vmem>>, vector<1x1x8x8xbf16>,
    %18 = arith.truncf %12 : vector<8x8xf32> to vector<8x8xbf16>
    %c0_15 = arith.constant 0 : index
    %c0_16 = arith.constant 0 : index
    %c0_17 = arith.constant 0 : index
    %c0_18 = arith.constant 0 : index
    %19 = vector.load %arg8[%c0_15, %c0_16, %c0_17, %c0_18] : memref<1x4x8x8xbf16, #tpu.memory_space<vmem>>, vector<1x1x8x8xbf16>
    %20 = vector.shape_cast %19 : vector<1x1x8x8xbf16> to vector<8x8xbf16>
    %21 = vector.shape_cast %18 : vector<8x8xbf16> to vector<1x1x8x8xbf16>
    tpu.vector_store %arg8[%c0_15, %c0_16, %c0_17, %c0_18], %21 {strides = array<i32>} : memref<1x4x8x8xbf16, #tpu.memory_space<vmem>>, vector<1x1x8x8xbf16>,
    %c0_19 = arith.constant 0 : index
    %c8 = arith.constant 8 : index
    %22 = vector.load %arg3[%c0_19, %c8] : memref<32x32xbf16, #tpu.memory_space<vmem>>, vector<32x8xbf16>
    %cst_20 = arith.constant dense<0.000000e+00> : vector<8x8xf32>
    %23 = tpu.matmul %2, %22, %cst_20 {dimension_numbers = #tpu.dot_dimension_numbers<[1], [0], [0], [1], [0, 0, 1, 1], [], []>} : vector<8x32xbf16>, vector<32x8xbf16>, vector<8x8xf32> -> vector<8x8xf32>
    %c0_21 = arith.constant 0 : index
    %c8_22 = arith.constant 8 : index
    %24 = vector.load %arg4[%c0_21, %c8_22] : memref<1x32xf32, #tpu.memory_space<vmem>>, vector<1x8xf32>
    %25 = vector.broadcast %24 : vector<1x8xf32> to vector<8x8xf32>
    %26 = arith.addf %23, %25 : vector<8x8xf32>
    %c0_23 = arith.constant 0 : index
    %c8_24 = arith.constant 8 : index
    %27 = vector.load %arg5[%c0_23, %c8_24] : memref<32x32xbf16, #tpu.memory_space<vmem>>, vector<32x8xbf16>
    %cst_25 = arith.constant dense<0.000000e+00> : vector<8x8xf32>
    %28 = tpu.matmul %2, %27, %cst_25 {dimension_numbers = #tpu.dot_dimension_numbers<[1], [0], [0], [1], [0, 0, 1, 1], [], []>} : vector<8x32xbf16>, vector<32x8xbf16>, vector<8x8xf32> -> vector<8x8xf32>
    %c0_26 = arith.constant 0 : index
    %c8_27 = arith.constant 8 : index
    %29 = vector.load %arg6[%c0_26, %c8_27] : memref<1x32xf32, #tpu.memory_space<vmem>>, vector<1x8xf32>
    %30 = vector.broadcast %29 : vector<1x8xf32> to vector<8x8xf32>
    %31 = arith.addf %28, %30 : vector<8x8xf32>
    %32 = arith.truncf %26 : vector<8x8xf32> to vector<8x8xbf16>
    %33 = tpu.transpose %32, [1, 0] : vector<8x8xbf16> -> vector<8x8xbf16>
    %c0_28 = arith.constant 0 : index
    %c1 = arith.constant 1 : index
    %c0_29 = arith.constant 0 : index
    %c0_30 = arith.constant 0 : index
    %34 = vector.load %arg7[%c0_28, %c1, %c0_29, %c0_30] : memref<1x4x8x8xbf16, #tpu.memory_space<vmem>>, vector<1x1x8x8xbf16>
    %35 = vector.shape_cast %34 : vector<1x1x8x8xbf16> to vector<8x8xbf16>
    %36 = vector.shape_cast %33 : vector<8x8xbf16> to vector<1x1x8x8xbf16>
    tpu.vector_store %arg7[%c0_28, %c1, %c0_29, %c0_30], %36 {strides = array<i32>} : memref<1x4x8x8xbf16, #tpu.memory_space<vmem>>, vector<1x1x8x8xbf16>,
    %37 = arith.truncf %31 : vector<8x8xf32> to vector<8x8xbf16>
    %c0_31 = arith.constant 0 : index
    %c1_32 = arith.constant 1 : index
    %c0_33 = arith.constant 0 : index
    %c0_34 = arith.constant 0 : index
    %38 = vector.load %arg8[%c0_31, %c1_32, %c0_33, %c0_34] : memref<1x4x8x8xbf16, #tpu.memory_space<vmem>>, vector<1x1x8x8xbf16>
    %39 = vector.shape_cast %38 : vector<1x1x8x8xbf16> to vector<8x8xbf16>
    %40 = vector.shape_cast %37 : vector<8x8xbf16> to vector<1x1x8x8xbf16>
    tpu.vector_store %arg8[%c0_31, %c1_32, %c0_33, %c0_34], %40 {strides = array<i32>} : memref<1x4x8x8xbf16, #tpu.memory_space<vmem>>, vector<1x1x8x8xbf16>,
    %c0_35 = arith.constant 0 : index
    %c16 = arith.constant 16 : index
    %41 = vector.load %arg3[%c0_35, %c16] : memref<32x32xbf16, #tpu.memory_space<vmem>>, vector<32x8xbf16>
    %cst_36 = arith.constant dense<0.000000e+00> : vector<8x8xf32>
    %42 = tpu.matmul %2, %41, %cst_36 {dimension_numbers = #tpu.dot_dimension_numbers<[1], [0], [0], [1], [0, 0, 1, 1], [], []>} : vector<8x32xbf16>, vector<32x8xbf16>, vector<8x8xf32> -> vector<8x8xf32>
    %c0_37 = arith.constant 0 : index
    %c16_38 = arith.constant 16 : index
    %43 = vector.load %arg4[%c0_37, %c16_38] : memref<1x32xf32, #tpu.memory_space<vmem>>, vector<1x8xf32>
    %44 = vector.broadcast %43 : vector<1x8xf32> to vector<8x8xf32>
    %45 = arith.addf %42, %44 : vector<8x8xf32>
    %c0_39 = arith.constant 0 : index
    %c16_40 = arith.constant 16 : index
    %46 = vector.load %arg5[%c0_39, %c16_40] : memref<32x32xbf16, #tpu.memory_space<vmem>>, vector<32x8xbf16>
    %cst_41 = arith.constant dense<0.000000e+00> : vector<8x8xf32>
    %47 = tpu.matmul %2, %46, %cst_41 {dimension_numbers = #tpu.dot_dimension_numbers<[1], [0], [0], [1], [0, 0, 1, 1], [], []>} : vector<8x32xbf16>, vector<32x8xbf16>, vector<8x8xf32> -> vector<8x8xf32>
    %c0_42 = arith.constant 0 : index
    %c16_43 = arith.constant 16 : index
    %48 = vector.load %arg6[%c0_42, %c16_43] : memref<1x32xf32, #tpu.memory_space<vmem>>, vector<1x8xf32>
    %49 = vector.broadcast %48 : vector<1x8xf32> to vector<8x8xf32>
    %50 = arith.addf %47, %49 : vector<8x8xf32>
    %51 = arith.truncf %45 : vector<8x8xf32> to vector<8x8xbf16>
    %52 = tpu.transpose %51, [1, 0] : vector<8x8xbf16> -> vector<8x8xbf16>
    %c0_44 = arith.constant 0 : index
    %c2 = arith.constant 2 : index
    %c0_45 = arith.constant 0 : index
    %c0_46 = arith.constant 0 : index
    %53 = vector.load %arg7[%c0_44, %c2, %c0_45, %c0_46] : memref<1x4x8x8xbf16, #tpu.memory_space<vmem>>, vector<1x1x8x8xbf16>
    %54 = vector.shape_cast %53 : vector<1x1x8x8xbf16> to vector<8x8xbf16>
    %55 = vector.shape_cast %52 : vector<8x8xbf16> to vector<1x1x8x8xbf16>
    tpu.vector_store %arg7[%c0_44, %c2, %c0_45, %c0_46], %55 {strides = array<i32>} : memref<1x4x8x8xbf16, #tpu.memory_space<vmem>>, vector<1x1x8x8xbf16>,
    %56 = arith.truncf %50 : vector<8x8xf32> to vector<8x8xbf16>
    %c0_47 = arith.constant 0 : index
    %c2_48 = arith.constant 2 : index
    %c0_49 = arith.constant 0 : index
    %c0_50 = arith.constant 0 : index
    %57 = vector.load %arg8[%c0_47, %c2_48, %c0_49, %c0_50] : memref<1x4x8x8xbf16, #tpu.memory_space<vmem>>, vector<1x1x8x8xbf16>
    %58 = vector.shape_cast %57 : vector<1x1x8x8xbf16> to vector<8x8xbf16>
    %59 = vector.shape_cast %56 : vector<8x8xbf16> to vector<1x1x8x8xbf16>
    tpu.vector_store %arg8[%c0_47, %c2_48, %c0_49, %c0_50], %59 {strides = array<i32>} : memref<1x4x8x8xbf16, #tpu.memory_space<vmem>>, vector<1x1x8x8xbf16>,
    %c0_51 = arith.constant 0 : index
    %c24 = arith.constant 24 : index
    %60 = vector.load %arg3[%c0_51, %c24] : memref<32x32xbf16, #tpu.memory_space<vmem>>, vector<32x8xbf16>
    %cst_52 = arith.constant dense<0.000000e+00> : vector<8x8xf32>
    %61 = tpu.matmul %2, %60, %cst_52 {dimension_numbers = #tpu.dot_dimension_numbers<[1], [0], [0], [1], [0, 0, 1, 1], [], []>} : vector<8x32xbf16>, vector<32x8xbf16>, vector<8x8xf32> -> vector<8x8xf32>
    %c0_53 = arith.constant 0 : index
    %c24_54 = arith.constant 24 : index
    %62 = vector.load %arg4[%c0_53, %c24_54] : memref<1x32xf32, #tpu.memory_space<vmem>>, vector<1x8xf32>
    %63 = vector.broadcast %62 : vector<1x8xf32> to vector<8x8xf32>
    %64 = arith.addf %61, %63 : vector<8x8xf32>
    %c0_55 = arith.constant 0 : index
    %c24_56 = arith.constant 24 : index
    %65 = vector.load %arg5[%c0_55, %c24_56] : memref<32x32xbf16, #tpu.memory_space<vmem>>, vector<32x8xbf16>
    %cst_57 = arith.constant dense<0.000000e+00> : vector<8x8xf32>
    %66 = tpu.matmul %2, %65, %cst_57 {dimension_numbers = #tpu.dot_dimension_numbers<[1], [0], [0], [1], [0, 0, 1, 1], [], []>} : vector<8x32xbf16>, vector<32x8xbf16>, vector<8x8xf32> -> vector<8x8xf32>
    %c0_58 = arith.constant 0 : index
    %c24_59 = arith.constant 24 : index
    %67 = vector.load %arg6[%c0_58, %c24_59] : memref<1x32xf32, #tpu.memory_space<vmem>>, vector<1x8xf32>
    %68 = vector.broadcast %67 : vector<1x8xf32> to vector<8x8xf32>
    %69 = arith.addf %66, %68 : vector<8x8xf32>
    %70 = arith.truncf %64 : vector<8x8xf32> to vector<8x8xbf16>
    %71 = tpu.transpose %70, [1, 0] : vector<8x8xbf16> -> vector<8x8xbf16>
    %c0_60 = arith.constant 0 : index
    %c3 = arith.constant 3 : index
    %c0_61 = arith.constant 0 : index
    %c0_62 = arith.constant 0 : index
    %72 = vector.load %arg7[%c0_60, %c3, %c0_61, %c0_62] : memref<1x4x8x8xbf16, #tpu.memory_space<vmem>>, vector<1x1x8x8xbf16>
    %73 = vector.shape_cast %72 : vector<1x1x8x8xbf16> to vector<8x8xbf16>
    %74 = vector.shape_cast %71 : vector<8x8xbf16> to vector<1x1x8x8xbf16>
    tpu.vector_store %arg7[%c0_60, %c3, %c0_61, %c0_62], %74 {strides = array<i32>} : memref<1x4x8x8xbf16, #tpu.memory_space<vmem>>, vector<1x1x8x8xbf16>,
    %75 = arith.truncf %69 : vector<8x8xf32> to vector<8x8xbf16>
    %c0_63 = arith.constant 0 : index
    %c3_64 = arith.constant 3 : index
    %c0_65 = arith.constant 0 : index
    %c0_66 = arith.constant 0 : index
    %76 = vector.load %arg8[%c0_63, %c3_64, %c0_65, %c0_66] : memref<1x4x8x8xbf16, #tpu.memory_space<vmem>>, vector<1x1x8x8xbf16>
    %77 = vector.shape_cast %76 : vector<1x1x8x8xbf16> to vector<8x8xbf16>
    %78 = vector.shape_cast %75 : vector<8x8xbf16> to vector<1x1x8x8xbf16>
    tpu.vector_store %arg8[%c0_63, %c3_64, %c0_65, %c0_66], %78 {strides = array<i32>} : memref<1x4x8x8xbf16, #tpu.memory_space<vmem>>, vector<1x1x8x8xbf16>,
    return
  }
  func.func @transform_0(%arg0: i32, %arg1: i32) -> (i32, i32, i32) {
    %c0_i32 = arith.constant 0 : i32
    %c0_i32_0 = arith.constant 0 : i32
    return %arg0, %arg1, %c0_i32 : i32, i32, i32
  }
  func.func @transform_1(%arg0: i32, %arg1: i32) -> (i32, i32) {
    %c0_i32 = arith.constant 0 : i32
    %c0_i32_0 = arith.constant 0 : i32
    %c0_i32_1 = arith.constant 0 : i32
    return %c0_i32, %c0_i32_0 : i32, i32
  }
  func.func @transform_2(%arg0: i32, %arg1: i32) -> (i32, i32) {
    %c0_i32 = arith.constant 0 : i32
    %c0_i32_0 = arith.constant 0 : i32
    %c0_i32_1 = arith.constant 0 : i32
    return %c0_i32, %c0_i32_0 : i32, i32
  }
  func.func @transform_3(%arg0: i32, %arg1: i32) -> (i32, i32) {
    %c0_i32 = arith.constant 0 : i32
    %c0_i32_0 = arith.constant 0 : i32
    %c0_i32_1 = arith.constant 0 : i32
    return %c0_i32, %c0_i32_0 : i32, i32
  }
  func.func @transform_4(%arg0: i32, %arg1: i32) -> (i32, i32) {
    %c0_i32 = arith.constant 0 : i32
    %c0_i32_0 = arith.constant 0 : i32
    %c0_i32_1 = arith.constant 0 : i32
    return %c0_i32, %c0_i32_0 : i32, i32
  }
  func.func @transform_5(%arg0: i32, %arg1: i32) -> (i32, i32, i32, i32) {
    %c0_i32 = arith.constant 0 : i32
    %c0_i32_0 = arith.constant 0 : i32
    %c0_i32_1 = arith.constant 0 : i32
    return %arg0, %c0_i32, %c0_i32_0, %arg1 : i32, i32, i32, i32
  }
  func.func @transform_6(%arg0: i32, %arg1: i32) -> (i32, i32, i32, i32) {
    %c0_i32 = arith.constant 0 : i32
    %c0_i32_0 = arith.constant 0 : i32
    %c0_i32_1 = arith.constant 0 : i32
    return %arg0, %c0_i32, %arg1, %c0_i32_0 : i32, i32, i32, i32
  }
}

</mosaic_0001>

<bundles_post_ra>
// kernel: tpu_custom_call.1
= control target key start
LH: loop header
LB: loop body
LE: loop exit
PB: predicated region body
PF: predicated region fallthrough
CT: control target
= control target key end

     0   :  { %12 = vsyncpa [#allocation3], 0  ;;  %s2046_s0 = inlined_call_operand.hbm [shape: f32[2,8,32], index: 0, kind: input, shape index: {}]   ;;  %s2047_s1 = inlined_call_operand.hbm [shape: bf16[32,32], index: 1, kind: input, shape index: {}]   ;;  %s2048_s2 = inlined_call_operand.vmem [shape: f32[1,32], index: 2, kind: input, shape index: {}]   ;;  %s2049_s3 = inlined_call_operand.hbm [shape: bf16[32,32], index: 3, kind: input, shape index: {}]   ;;  %s2050_s4 = inlined_call_operand.vmem [shape: f32[1,32], index: 4, kind: input, shape index: {}]   ;;  %s2051_s5 = inlined_call_operand.hbm [shape: bf16[2,4,8,8], index: 5, kind: output, shape index: {0}]   ;;  %s2052_s6 = inlined_call_operand.hbm [shape: bf16[2,4,8,8], index: 6, kind: output, shape index: {1}]  }
   0x1   :  { %14 = vsyncpa [#allocation3 + $0x1], 0 }
   0x2   :  { %15 = vsyncpa [#allocation6], 0 }
   0x3   :  { %16 = vsyncpa [#allocation4], 0 }
   0x4   :  { %18 = vsyncpa [#allocation4 + $0x1], 0 }
   0x5   :  { %19 = vsyncpa [#allocation10], 0 }
   0x6   :  { %21 = vsyncpa [#allocation10 + $0x1], 0  ;;  %s1653_s21 = smov 0   ;;  %s1655_s22 = smov 0  }
   0x7   :  { %s1657_s23 = smov 0   ;;  %s1659_s24 = smov 0  }
   0x8   :  { %s1661_s25 = smov 0   ;;  %s1663_s26 = smov 0  }
   0x9 LB: > { %s1134_s27 = sadd.s32 4294967295, %s1602_s26   ;;  %s1135_s28 = sadd.s32 4294967294, %s1602_s26   ;;  %s1602_s26 = sphi %s1663_s26, %s27_s26   ;;  %s1598_s25 = sphi %s1661_s25, %s2077_s25   ;;  %s1594_s24 = sphi %s1659_s24, %s2076_s24   ;;  %s1590_s23 = sphi %s1657_s23, %s2075_s23   ;;  %s1586_s22 = sphi %s1655_s22, %s2074_s22   ;;  %s1582_s21 = sphi %s1653_s21, %s2073_s21  }
   0xa   : > { %p61_p0 = scmp.ne.s32.totalorder %s1586_s22, %s1582_s21  ;;  %p1687_p1 = scmp.eq.s32.totalorder %s1134_s27, 0 }
   0xb   : > { %p1691_p2 = scmp.eq.s32.totalorder %s1134_s27, 1  ;;  %p177_p3 = scmp.eq.s32.totalorder %s1135_s28, 1 }
   0xc   : > { %s2058_s29 = scalar_select %p1687_p1, 1, 0 }
   0xd   : > { %p1697_p4 = por %p1687_p1, %p61_p0  ;;  %p1136_p5 = scmp.ge.s32.totalorder %s1602_s26, 1 }
   0xe   : > { %p1702_p6 = por %p177_p3, %p61_p0  ;;  %p212_p7 = scmp.lt.s32.totalorder %s1602_s26, 3 }
   0xf   : > { %s2060_s7 = scalar_select %p1697_p4, 1, 0 }
  0x10   : > { %s2061_s8 = scalar_select %p1702_p6, 1, 0 }
  0x11   : > { %p1707_p8 = pnand %p1136_p5, %p212_p7  ;;  %s1604_s10 = smov [#allocation5]  }
  0x12   : > { %2062 = sst [smem:[#allocation15_spill]] %s2061_s8  ;;  %s224_s11 = sshll.u32 %s1604_s10, 4  ;;  %s1711_s11 = int_to_ptr.vmem [resolvable:$true] %s224_s11 }
  0x13   : > { %p1298_p9 = pneg %p1707_p8  ;;  %s1605_s13 = smov [#allocation7]  }
  0x14   : > { %s240_s14 = sshll.u32 %s1605_s13, 4  ;;  %s1398_s17 = scalar_lea.hbm %s2047_s1, 256  ;;  %s1722_s14 = int_to_ptr.vmem [resolvable:$true] %s240_s14 }
  0x15   : > { %p1718_p11 = pnand %p1298_p9, %p1687_p1  ;;  %p1399_p12 = scmp.ne.s32.totalorder %s2047_s1, %s1398_s17 }
  0x16   : > { %p1405_p5 = scmp.lt.u32.totalorder %s1398_s17, %s2047_s1 }
  0x17   : > { %p1400_p13 = pneg %p1718_p11 }
  0x19   : > { %p1401_p0 = pnand %p1400_p13, %p1399_p12 }
  0x1b   : > { %p1402_p3 = pneg %p1401_p0 }
  0x1d   : > { %p1407_p7 = pnand %p1405_p5, %p1402_p3 }
  0x1f   : > { %1410 = shalt.err (!%p1407_p7)
}
  0x20   : > { %s1411_s28 = scalar_lea.vmem %s1711_s11, 256  ;;  %p1419_p1 = scmp.lt.s32.totalorder %s1711_s11, %s1711_s11 }
  0x21   : > { %p1412_p9 = scmp.ne.s32.totalorder %s1711_s11, %s1411_s28  ;;  %p1420_p12 = scmp.lt.s32.totalorder %s1411_s28, %s1411_s28 }
  0x23   : > { %p1414_p10 = pnand %p1412_p9, %p1400_p13  ;;  %p1421_p0 = por %p1420_p12, %p1419_p1 }
  0x25   : > { %p1415_p6 = pneg %p1414_p10 }
  0x27   : > { %p1422_p4 = pnand %p1421_p0, %p1415_p6 }
  0x29   : > { %1425 = shalt.err (!%p1422_p4)
}
  0x2a   : > { %s1606_s10 = smov 64   ;;  %s1607_s13 = smov 4  }
  0x2b   : > { %1301 = dma.hbm_to_vmem [thread:$0]  (!%p1718_p11), %s2047_s1, 256, %s1711_s11, [#allocation6], %s1606_s10, %s1606_s10, %s1607_s13  }
  0x2c   : > { %s1426_s19 = scalar_lea.hbm %s2049_s3, 256 }
  0x2d   : > { %p1427_p1 = scmp.ne.s32.totalorder %s2049_s3, %s1426_s19  ;;  %p1433_p10 = scmp.lt.u32.totalorder %s1426_s19, %s2049_s3 }
  0x2f   : > { %p1429_p4 = pnand %p1427_p1, %p1400_p13 }
  0x31   : > { %p1430_p6 = pneg %p1429_p4 }
  0x33   : > { %p1435_p3 = pnand %p1433_p10, %p1430_p6 }
  0x35   : > { %1438 = shalt.err (!%p1435_p3)
}
  0x36   : > { %s1439_s11 = scalar_lea.vmem %s1722_s14, 256  ;;  %p1447_p12 = scmp.lt.s32.totalorder %s1722_s14, %s1722_s14 }
  0x37   : > { %p1440_p5 = scmp.ne.s32.totalorder %s1722_s14, %s1439_s11  ;;  %p1448_p0 = scmp.lt.s32.totalorder %s1439_s11, %s1439_s11 }
  0x39   : > { %p1442_p7 = pnand %p1440_p5, %p1400_p13  ;;  %p1449_p1 = por %p1448_p0, %p1447_p12 }
  0x3b   : > { %p1443_p9 = pneg %p1442_p7 }
  0x3d   : > { %p1450_p4 = pnand %p1449_p1, %p1443_p9 }
  0x3f   : > { %1453 = shalt.err (!%p1450_p4)
}
  0x40   : > { %1304 = dma.hbm_to_vmem [thread:$0]  (!%p1718_p11), %s2049_s3, 256, %s1722_s14, [#allocation6], %s1606_s10, %s1606_s10, %s1607_s13  }
  0x41   : > { %s39_s16 = sadd.s32 1, %s1598_s25  ;;  %s48_s17 = sadd.s32 1, %s1590_s23 }
  0x42   : > { %p41_p13 = scmp.ge.s32.totalorder %s39_s16, 2  ;;  %p55_p6 = scmp.ne.s32.totalorder %s1590_s23, %s1586_s22 }
  0x43   : > { %p56_p10 = scmp.eq.s32.totalorder %s1602_s26, 0  ;;  %p1318_p3 = scmp.lt.s32.totalorder %s1602_s26, 2 }
  0x44   : > { %s2079_s16 = smov (%p41_p13, %s39_s16), 0  ;;  %p1786_p7 = por %p1691_p2, %p55_p6 }
  0x45   : > { %p57_p5 = por %p56_p10, %p55_p6  ;;  %s43_s18 = ssub.s32 %s1598_s25, %s2079_s16 }
  0x46   : > { %s2065_s12 = scalar_select %p1786_p7, 1, 0 }
  0x47   : > { %s257_s19 = sand.u32 1, %s1590_s23   ;;  %p46_p9 = scmp.eq.s32.totalorder %s43_s18, 0 }
  0x48   : > { %s1140_s14 = sshll.u32 %s257_s19, 3  ;;  %s1141_s10 = sshll.u32 %s1598_s25, 7 }
  0x49   : > { %s1795_s13 = scalar_select %p46_p9, %s1590_s23, %s48_s17  }
  0x4a   : > { %s1800_s28 = scalar_lea.hbm %s2046_s0, %s1141_s10  ;;  %s261_s30 = scalar_lea.vmem [#allocation2], %s1140_s14 }
  0x4b   : > { %s269_s11 = sshll.u32 %s261_s30, 4  ;;  %p1804_p2 = pnand %p1318_p3, %p57_p5  ;;  %s1808_s11 = int_to_ptr.vmem [resolvable:$true] %s269_s11 }
  0x4c   : > { %s258_s15 = scalar_lea.sflag [#allocation3], %s257_s19  ;;  %s1454_s17 = scalar_lea.hbm %s1800_s28, 128 }
  0x4d   : > { %p1455_p11 = scmp.ne.s32.totalorder %s1800_s28, %s1454_s17  ;;  %p1456_p12 = pneg %p1804_p2 }
  0x4e   : > { %s1459_s10 = scalar_lea.hbm %s2046_s0, 256  ;;  %p1460_p4 = scmp.lt.u32.totalorder %s1800_s28, %s2046_s0 }
  0x4f   : > { %p1457_p0 = pnand %p1456_p12, %p1455_p11  ;;  %p1461_p13 = scmp.lt.u32.totalorder %s1459_s10, %s1454_s17 }
  0x50   : > { %p1463_p10 = scmp.lt.u32.totalorder %s1454_s17, %s1800_s28 }
  0x51   : > { %p1458_p1 = pneg %p1457_p0  ;;  %p1462_p6 = por %p1461_p13, %p1460_p4 }
  0x53   : > { %p1464_p3 = por %p1463_p10, %p1462_p6 }
  0x55   : > { %p1465_p5 = pnand %p1464_p3, %p1458_p1 }
  0x57   : > { %1468 = shalt.err (!%p1465_p5)
}
  0x58   : > { %s1469_s19 = scalar_lea.vmem %s1808_s11, 128  ;;  %s1608_s30 = smov [#allocation2]  }
  0x59   : > { %p1470_p9 = scmp.ne.s32.totalorder %s1808_s11, %s1469_s19  ;;  %s1474_s18 = sshll.u32 %s1608_s30, 4  ;;  %s1475_s18 = int_to_ptr.vmem [resolvable:$false] %s1474_s18 }
  0x5a   : > { %s1476_s14 = scalar_lea.vmem %s1475_s18, 256  ;;  %p1477_p7 = scmp.lt.s32.totalorder %s1808_s11, %s1475_s18 }
  0x5b   : > { %p1472_p11 = pnand %p1470_p9, %p1456_p12  ;;  %p1478_p4 = scmp.lt.s32.totalorder %s1476_s14, %s1469_s19 }
  0x5d   : > { %p1473_p0 = pneg %p1472_p11  ;;  %p1479_p13 = por %p1478_p4, %p1477_p7 }
  0x5f   : > { %p1480_p6 = pnand %p1479_p13, %p1473_p0 }
  0x61   : > { %1483 = shalt.err (!%p1480_p6)
}
  0x62   : > { %1308 = dma.hbm_to_vmem [thread:$0]  (!%p1804_p2), %s1800_s28, 128, %s1808_s11, %s258_s15  }
  0x63   : > { %278 = sbr.rel (%p1707_p8) target bundleno = 584 (0x248), region = 40  ;;  %s1838_s17 = sand.u32 (!%p1707_p8), 1, %s1586_s22  }
  0x64   : > { %s1143_s10 = sshll.u32 (!%p1707_p8), %s1838_s17, 3  ;;  %s281_s20 = scalar_lea.sflag (!%p1707_p8), [#allocation3], %s1838_s17 }
  0x65   : > { %s1842_s27 = scalar_lea.vmem (!%p1707_p8), [#allocation2], %s1143_s10  ;;  %p2067_p7 = scmp.ne.s32.totalorder (!%p1707_p8), %s2060_s7, 0 }
  0x6a   : > { %1565 = dma.done.wait (%p2067_p7), %s281_s20, 128  }
  0x6b   : > { %1567 = vsyncadd (%p2067_p7), %s281_s20, 4294967168  ;;  %p2068_p2 = scmp.ne.s32.totalorder %s2058_s29, 0 }
  0x6d   : > { %1569 = dma.done.wait (%p2068_p2), [#allocation6], 512  }
  0x6e   : > { %1571 = vsyncadd (%p2068_p2), [#allocation6], 4294966784  ;;  %v1609_v0 = vmov 0.0   ;;  %vm1610_vm0 = vmmov 0   ;;  %v1382_v1 = vld [vmem:[#allocation5] sm:$0xff]   ;;  %v1383_v2 = vld [vmem:[#allocation5 + $0x8] sm:$0xff]  }
  0x6f   : > { %1220 = vmatprep.subr.bf16.mxu0 %v1609_v0  ;;  %1224 = vmatprep.mubr.msk.bf16.mxu0 %vm1610_vm0, %v1609_v0  ;;  %s1611_s7 = smov 120   ;;  %v1384_v3 = vld [vmem:[#allocation5] sm:$0xff]   ;;  %s1612_s29 = smov 112   ;;  %v1385_v4 = vld [vmem:[#allocation5 + $0x8] sm:$0xff]   ;;  %v1388_v7 = vld [vmem:[#allocation7] sm:$0xff]   ;;  %vm352_vm1 = vcmask 261120  }
  0x70   : > { %1228 = vmatprep.subr.bf16.mxu1 %v1609_v0  ;;  %1232 = vmatprep.mubr.msk.bf16.mxu1 %vm1610_vm0, %v1609_v0  ;;  %v1386_v5 = vld [vmem:[#allocation5] sm:$0xff]   ;;  %v1387_v6 = vld [vmem:[#allocation5 + $0x8] sm:$0xff]   ;;  %s1613_s9 = smov 104   ;;  %v1389_v8 = vld [vmem:[#allocation7 + $0x8] sm:$0xff]   ;;  %s1146_s19 = sshll.u32 %s1838_s17, 4  ;;  %vm476_vm2 = vcmask 60416  }
  0x71   : > { %500 = vrot.lane.b32.xlu0 %v1382_v1, %s1611_s7  ;;  %660 = vrot.lane.b32.xlu1 %v1384_v3, %s1612_s29  ;;  %v1390_v9 = vld [vmem:[#allocation7] sm:$0xff]   ;;  %v1394_v10 = vld [vmem:[#allocation5] sm:$0xff]   ;;  %v1395_v11 = vld [vmem:[#allocation5 + $0x8] sm:$0xff]   ;;  %s1928_s30 = scalar_lea.vmem [#allocation9], %s1146_s19  ;;  %s1932_s18 = scalar_lea.vmem [#allocation8], %s1146_s19 }
  0x72   : > { %1221 = vmatpush3.bf16.msra.mxu0 %v1394_v10  ;;  %v327_v12 = vld [vmem:[%s1842_s27] sm:$0xff]  ;;  %s997_s14 = sshll.u32 %s1928_s30, 4  ;;  %s1194_s10 = sshll.u32 %s1594_s24, 8  ;;  %s1942_s14 = int_to_ptr.vmem [resolvable:$true] %s997_s14 }
  0x73   : > { %1222 = vmatprep.subr.bf16.mxu0 %v1609_v0  ;;  %v1396_v13 = vld [vmem:[#allocation7] sm:$0xff]   ;;  %v1391_v14 = vld [vmem:[#allocation7 + $0x8] sm:$0xff]   ;;  %v1868_v15 = vpack.c.bf16 %v327_v12, %v327_v12  ;;  %p2069_p12 = scmp.ne.s32.totalorder %s2065_s12, 0  ;;  %s1614_s28 = smov [#allocation9]  }
  0x74   : > { %1229 = vmatpush3.bf16.msra.mxu1 %v1396_v13  ;;  %v1397_v16 = vld [vmem:[#allocation7 + $0x8] sm:$0xff]   ;;  %v1392_v17 = vld [vmem:[#allocation7] sm:$0xff]   ;;  %s1488_s11 = sshll.u32 %s1614_s28, 4  ;;  %s1489_s11 = int_to_ptr.vmem [resolvable:$false] %s1488_s11 }
  0x75   : > { %502 = vrot.lane.b32.xlu0 %v1383_v2, %s1611_s7  ;;  %662 = vrot.lane.b32.xlu1 %v1385_v4, %s1612_s29  ;;  %v1393_v18 = vld [vmem:[#allocation7 + $0x8] sm:$0xff]   ;;  %v1156_v19 = vld [vmem:[%s2048_s2] ss:$0 sm:$0xff]  ;;  %s1490_s8 = scalar_lea.vmem %s1489_s11, 512  ;;  %p1491_p3 = scmp.lt.s32.totalorder %s1942_s14, %s1489_s11 }
  0x76   : > { %1223 = vmatpush3.bf16.msra.mxu0 %v1395_v11  ;;  %1230 = vmatprep.subr.bf16.mxu1 %v1609_v0  ;;  %v1160_v20 = vld [vmem:[%s2050_s4] ss:$0 sm:$0xff] }
  0x77   : > { %1236 = vmatprep.subr.bf16.mxu0 %v1609_v0 }
  0x78   : > { %1231 = vmatpush3.bf16.msra.mxu1 %v1397_v16 }
  0x79   : > { %820 = vrot.lane.b32.xlu0 %v1386_v5, %s1613_s9  ;;  %822 = vrot.lane.b32.xlu1 %v1387_v6, %s1613_s9 }
  0x7a   : > { %1225 = vmatmul.mubr.msk.bf16.vlgmr.msra.gmra.mrb[0].mxu0 %vm352_vm1, %v1868_v15  ;;  %1244 = vmatprep.subr.bf16.mxu1 %v1609_v0 }
  0x7b   : > { %1240 = vmatprep.mubr.msk.bf16.mxu0 %vm1610_vm0, %v1609_v0  ;;  %1233 = vmatmul.mubr.msk.bf16.vlgmr.msra.gmra.mrb[0].mxu1 %vm352_vm1, %v1868_v15 }
  0x7c   : > { %1248 = vmatprep.mubr.msk.bf16.mxu1 %vm1610_vm0, %v1609_v0 }
  0x7d   : > { %569 = vrot.lane.b32.xlu0 %v1388_v7, %s1611_s7  ;;  %571 = vrot.lane.b32.xlu1 %v1389_v8, %s1611_s7 }
  0x81   : > { %729 = vrot.lane.b32.xlu0 %v1390_v9, %s1612_s29  ;;  %731 = vrot.lane.b32.xlu1 %v1391_v14, %s1612_s29 }
  0x85   : > { %889 = vrot.lane.b32.xlu0 %v1392_v17, %s1613_s9  ;;  %891 = vrot.lane.b32.xlu1 %v1393_v18, %s1613_s9 }
  0x89   : > { %506 = vrot.lane.b32.xlu0 %v1156_v19, %s1611_s7  ;;  %666 = vrot.lane.b32.xlu1 %v1156_v19, %s1612_s29 }
  0x8d   : > { %826 = vrot.lane.b32.xlu0 %v1156_v19, %s1613_s9  ;;  %575 = vrot.lane.b32.xlu1 %v1160_v20, %s1611_s7  ;;  %s1949_s7 = scalar_lea.hbm %s2052_s6, %s1194_s10 }
  0x91   : > { %735 = vrot.lane.b32.xlu0 %v1160_v20, %s1612_s29  ;;  %895 = vrot.lane.b32.xlu1 %v1160_v20, %s1613_s9  ;;  %s966_s29 = scalar_lea.sflag [#allocation10], %s1838_s17  ;;  %s1484_s9 = scalar_lea.vmem %s1942_s14, 256 }
  0x92   : > { %p1485_p8 = scmp.ne.s32.totalorder %s1942_s14, %s1484_s9  ;;  %p1492_p5 = scmp.lt.s32.totalorder %s1490_s8, %s1484_s9 }
  0x94   : > { %p1486_p1 = pnand %p1485_p8, %p2069_p12  ;;  %p1493_p9 = por %p1492_p5, %p1491_p3 }
  0x96   : > { %p1487_p10 = pneg %p1486_p1 }
  0x98   : > { %p1494_p11 = pnand %p1493_p9, %p1487_p10 }
  0xe3   : > { %v501_v21 = vpop.permute.xlu0 %500  ;;  %v661_v22 = vpop.permute.xlu1 %660 }
  0xe4   : > { %1237 = vmatpush3.bf16.msra.mxu0 %v501_v21 }
  0xe5   : > { %1238 = vmatprep.subr.bf16.mxu0 %v1609_v0 }
  0xe7   : > { %v503_v23 = vpop.permute.xlu0 %502  ;;  %v663_v24 = vpop.permute.xlu1 %662 }
  0xe8   : > { %1239 = vmatpush3.bf16.msra.mxu0 %v503_v23 }
  0xe9   : > { %1252 = vmatprep.subr.bf16.mxu0 %v1609_v0 }
  0xeb   : > { %1241 = vmatmul.mubr.msk.bf16.vlgmr.msra.gmra.mrb[4].mxu0 %vm352_vm1, %v1868_v15  ;;  %v821_v25 = vpop.permute.xlu0 %820  ;;  %v823_v26 = vpop.permute.xlu1 %822 }
  0xec   : > { %1253 = vmatpush3.bf16.msra.mxu0 %v661_v22  ;;  %1256 = vmatprep.mubr.msk.bf16.mxu0 %vm1610_vm0, %v1609_v0 }
  0xed   : > { %1254 = vmatprep.subr.bf16.mxu0 %v1609_v0 }
  0xef   : > { %v570_v27 = vpop.permute.xlu0 %569  ;;  %v572_v28 = vpop.permute.xlu1 %571 }
  0xf0   : > { %1255 = vmatpush3.bf16.msra.mxu0 %v663_v24  ;;  %1245 = vmatpush3.bf16.msra.mxu1 %v570_v27 }
  0xf1   : > { %1268 = vmatprep.subr.bf16.mxu0 %v1609_v0  ;;  %1246 = vmatprep.subr.bf16.mxu1 %v1609_v0 }
  0xf3   : > { %1257 = vmatmul.mubr.msk.bf16.vlgmr.msra.gmra.mrb[8].mxu0 %vm352_vm1, %v1868_v15  ;;  %v730_v29 = vpop.permute.xlu0 %729  ;;  %v732_v30 = vpop.permute.xlu1 %731 }
  0xf4   : > { %1269 = vmatpush3.bf16.msra.mxu0 %v821_v25  ;;  %1272 = vmatprep.mubr.msk.bf16.mxu0 %vm1610_vm0, %v1609_v0 }
  0xf5   : > { %1270 = vmatprep.subr.bf16.mxu0 %v1609_v0  ;;  %1247 = vmatpush3.bf16.msra.mxu1 %v572_v28 }
  0xf6   : > { %1260 = vmatprep.subr.bf16.mxu1 %v1609_v0 }
  0xf7   : > { %v890_v31 = vpop.permute.xlu0 %889  ;;  %v892_v32 = vpop.permute.xlu1 %891 }
  0xf8   : > { %1271 = vmatpush3.bf16.msra.mxu0 %v823_v26  ;;  %1249 = vmatmul.mubr.msk.bf16.vlgmr.msra.gmra.mrb[4].mxu1 %vm352_vm1, %v1868_v15 }
  0xf9   : > { %1261 = vmatpush3.bf16.msra.mxu1 %v730_v29  ;;  %1264 = vmatprep.mubr.msk.bf16.mxu1 %vm1610_vm0, %v1609_v0 }
  0xfa   : > { %1262 = vmatprep.subr.bf16.mxu1 %v1609_v0 }
  0xfb   : > { %1273 = vmatmul.mubr.msk.bf16.vlgmr.msra.gmra.mrb[12].mxu0 %vm352_vm1, %v1868_v15  ;;  %v507_v45 = vpop.permute.xlu0 %506  ;;  %v667_v55 = vpop.permute.xlu1 %666 }
  0xfd   : > { %1263 = vmatpush3.bf16.msra.mxu1 %v732_v30 }
  0xfe   : > { %1276 = vmatprep.subr.bf16.mxu1 %v1609_v0 }
  0xff   : > { %v827_v46 = vpop.permute.xlu0 %826  ;;  %v576_v62 = vpop.permute.xlu1 %575 }
 0x100   : > { %1265 = vmatmul.mubr.msk.bf16.vlgmr.msra.gmra.mrb[8].mxu1 %vm352_vm1, %v1868_v15 }
 0x101   : > { %1277 = vmatpush3.bf16.msra.mxu1 %v890_v31  ;;  %1280 = vmatprep.mubr.msk.bf16.mxu1 %vm1610_vm0, %v1609_v0 }
 0x102   : > { %1278 = vmatprep.subr.bf16.mxu1 %v1609_v0 }
 0x103   : > { %v736_v48 = vpop.permute.xlu0 %735  ;;  %v896_v17 = vpop.permute.xlu1 %895 }
 0x105   : > { %1279 = vmatpush3.bf16.msra.mxu1 %v892_v32 }
 0x108   : > { %1281 = vmatmul.mubr.msk.bf16.vlgmr.msra.gmra.mrb[12].mxu1 %vm352_vm1, %v1868_v15 }
 0x14d   : > { %v390_v33 = vpop.f32.mrb[0].mxu0 }
 0x14e   : > { %v391_v34 = vadd.f32 %v1156_v19, %v390_v33  ;;  %v1226_v35 = vpop.f32.mrb[1].mxu0  ;;  %v453_v39 = vpop.f32.mrb[0].mxu1 }
 0x14f   : > { %v393_v36 = vpop.f32.mrb[2].mxu0  ;;  %v454_v40 = vadd.f32 %v1160_v20, %v453_v39  ;;  %v1234_v41 = vpop.f32.mrb[1].mxu1 }
 0x150   : > { %v459_v37 = vpack.c.bf16 %v391_v34, %v391_v34  ;;  %v1227_v38 = vpop.f32.mrb[3].mxu0  ;;  %v456_v42 = vpop.f32.mrb[2].mxu1 }
 0x151   : > { %v478_v43 = vpack.c.bf16 %v454_v40, %v454_v40  ;;  %v1235_v44 = vpop.f32.mrb[3].mxu1 }
 0x152   : > { %460 = vxpose.xlu0.c.b16.start.end [1/1] (short) (narrow) %v459_v37, 16 }
 0x153   : > { %479 = vst.msk [vmem:[%s1928_s30] sm:$0xf] %vm476_vm2, %v478_v43 }
 0x1b8   : > { %v468_v54 = vpop.trf.xlu0 }
 0x1b9   : > { %477 = vst.msk [vmem:[%s1932_s18] sm:$0xf] %vm476_vm2, %v468_v54 }
 0x1be   : > { %v543_v47 = vpop.f32.mrb[4].mxu0 }
 0x1bf   : > { %v544_v49 = vadd.f32 %v543_v47, %v507_v45  ;;  %v1242_v50 = vpop.f32.mrb[5].mxu0 }
 0x1c0   : > { %v546_v51 = vpop.f32.mrb[6].mxu0 }
 0x1c1   : > { %v618_v52 = vpack.c.bf16 %v544_v49, %v544_v49  ;;  %v1243_v53 = vpop.f32.mrb[7].mxu0 }
 0x1c3   : > { %619 = vxpose.xlu1.c.b16.start.end [1/1] (short) (narrow) %v618_v52, 16 }
 0x1c6   : > { %v703_v56 = vpop.f32.mrb[8].mxu0 }
 0x1c7   : > { %v704_v57 = vadd.f32 %v703_v56, %v667_v55  ;;  %v1258_v58 = vpop.f32.mrb[9].mxu0 }
 0x1c8   : > { %v706_v59 = vpop.f32.mrb[10].mxu0 }
 0x1c9   : > { %v778_v60 = vpack.c.bf16 %v704_v57, %v704_v57  ;;  %v1259_v61 = vpop.f32.mrb[11].mxu0 }
 0x1cb   : > { %779 = vxpose.xlu0.c.b16.start.end [1/1] (short) (narrow) %v778_v60, 16  ;;  %v612_v63 = vpop.f32.mrb[4].mxu1 }
 0x1cc   : > { %v1250_v0 = vpop.f32.mrb[5].mxu1  ;;  %v613_v1 = vadd.f32 %v612_v63, %v576_v62 }
 0x1cd   : > { %v615_v2 = vpop.f32.mrb[6].mxu1 }
 0x1ce   : > { %v863_v3 = vpop.f32.mrb[12].mxu0  ;;  %v1251_v4 = vpop.f32.mrb[7].mxu1  ;;  %v637_v5 = vpack.c.bf16 %v613_v1, %v613_v1 }
 0x1cf   : > { %v864_v6 = vadd.f32 %v863_v3, %v827_v46  ;;  %v1274_v7 = vpop.f32.mrb[13].mxu0 }
 0x1d0   : > { %v866_v8 = vpop.f32.mrb[14].mxu0  ;;  %1165 = vst.msk [vmem:[%s1928_s30 + $0x4] sm:$0xf] %vm476_vm2, %v637_v5 }
 0x1d1   : > { %v938_v9 = vpack.c.bf16 %v864_v6, %v864_v6  ;;  %v1275_v10 = vpop.f32.mrb[15].mxu0 }
 0x1d3   : > { %939 = vxpose.xlu0.c.b16.start.end [1/1] (short) (narrow) %v938_v9, 16  ;;  %v772_v11 = vpop.f32.mrb[8].mxu1 }
 0x1d4   : > { %v773_v12 = vadd.f32 %v772_v11, %v736_v48  ;;  %v1266_v13 = vpop.f32.mrb[9].mxu1 }
 0x1d5   : > { %v775_v14 = vpop.f32.mrb[10].mxu1 }
 0x1d6   : > { %v797_v15 = vpack.c.bf16 %v773_v12, %v773_v12  ;;  %v1267_v16 = vpop.f32.mrb[11].mxu1 }
 0x1d8   : > { %1175 = vst.msk [vmem:[%s1928_s30 + $0x8] sm:$0xf] %vm476_vm2, %v797_v15 }
 0x1db   : > { %v932_v18 = vpop.f32.mrb[12].mxu1 }
 0x1dc   : > { %v933_v19 = vadd.f32 %v932_v18, %v896_v17  ;;  %v1282_v20 = vpop.f32.mrb[13].mxu1 }
 0x1dd   : > { %v935_v21 = vpop.f32.mrb[14].mxu1 }
 0x1de   : > { %v957_v22 = vpack.c.bf16 %v933_v19, %v933_v19  ;;  %v1283_v23 = vpop.f32.mrb[15].mxu1 }
 0x1e0   : > { %1185 = vst.msk [vmem:[%s1928_s30 + $0xc] sm:$0xf] %vm476_vm2, %v957_v22 }
 0x1e1   : > { %1497 = shalt.err (!%p1494_p11)
}
 0x1e2   : > { %s1498_s15 = scalar_lea.hbm %s1949_s7, 256  ;;  %s1502_s20 = scalar_lea.hbm %s2052_s6, 512 }
 0x1e3   : > { %p1499_p0 = scmp.ne.s32.totalorder %s1949_s7, %s1498_s15  ;;  %p1503_p6 = scmp.lt.u32.totalorder %s1949_s7, %s2052_s6 }
 0x1e4   : > { %p1504_p7 = scmp.lt.u32.totalorder %s1502_s20, %s1498_s15  ;;  %p1506_p8 = scmp.lt.u32.totalorder %s1498_s15, %s1949_s7 }
 0x1e5   : > { %p1500_p4 = pnand %p1499_p0, %p2069_p12 }
 0x1e6   : > { %p1505_p2 = por %p1504_p7, %p1503_p6 }
 0x1e7   : > { %p1501_p13 = pneg %p1500_p4 }
 0x1e8   : > { %p1507_p1 = por %p1506_p8, %p1505_p2 }
 0x1ea   : > { %p1508_p10 = pnand %p1507_p1, %p1501_p13 }
 0x1ec   : > { %1511 = shalt.err (!%p1508_p10)
}
 0x1ed   : > { %s1615_s9 = smov 64   ;;  %s1616_s11 = smov 4  }
 0x1ee   : > { %1295 = dma.vmem_to_hbm [thread:$0]  (%p2069_p12), %s1942_s14, 256, %s1949_s7, %s966_s29, %s1615_s9, %s1615_s9, %s1616_s11  }
 0x1ef   : > { %s980_s8 = sshll.u32 %s1932_s18, 4  ;;  %s1992_s30 = scalar_lea.hbm %s2051_s5, %s1194_s10  ;;  %s1985_s8 = int_to_ptr.vmem [resolvable:$true] %s980_s8 }
 0x1f0   : > { %s961_s14 = scalar_lea.sflag [#allocation4], %s1838_s17  ;;  %s1512_s7 = scalar_lea.vmem %s1985_s8, 256 }
 0x1f1   : > { %p1513_p3 = scmp.ne.s32.totalorder %s1985_s8, %s1512_s7  ;;  %s1617_s29 = smov [#allocation8]  }
 0x1f2   : > { %s1516_s20 = sshll.u32 %s1617_s29, 4  ;;  %s1517_s20 = int_to_ptr.vmem [resolvable:$false] %s1516_s20 }
 0x1f3   : > { %p1514_p5 = pnand %p1513_p3, %p2069_p12  ;;  %s1518_s24 = scalar_lea.vmem %s1517_s20, 512 }
 0x1f4   : > { %p1519_p11 = scmp.lt.s32.totalorder %s1985_s8, %s1517_s20  ;;  %p1520_p0 = scmp.lt.s32.totalorder %s1518_s24, %s1512_s7 }
 0x1f5   : > { %p1515_p9 = pneg %p1514_p5 }
 0x1f6   : > { %p1521_p4 = por %p1520_p0, %p1519_p11 }
 0x1f8   : > { %p1522_p13 = pnand %p1521_p4, %p1515_p9 }
 0x229   : > { %v627_v24 = vpop.trf.xlu1 }
 0x22a   : > { %1164 = vst.msk [vmem:[%s1932_s18 + $0x4] sm:$0xf] %vm476_vm2, %v627_v24 }
 0x231   : > { %v787_v25 = vpop.trf.xlu0 }
 0x232   : > { %1174 = vst.msk [vmem:[%s1932_s18 + $0x8] sm:$0xf] %vm476_vm2, %v787_v25 }
 0x239   : > { %v947_v26 = vpop.trf.xlu0 }
 0x23a   : > { %1184 = vst.msk [vmem:[%s1932_s18 + $0xc] sm:$0xf] %vm476_vm2, %v947_v26 }
 0x23b   : > { %1525 = shalt.err (!%p1522_p13)
}
 0x23c   : > { %s1526_s18 = scalar_lea.hbm %s1992_s30, 256  ;;  %s1530_s28 = scalar_lea.hbm %s2051_s5, 512 }
 0x23d   : > { %p1527_p6 = scmp.ne.s32.totalorder %s1992_s30, %s1526_s18  ;;  %p1531_p8 = scmp.lt.u32.totalorder %s1992_s30, %s2051_s5 }
 0x23e   : > { %p1532_p1 = scmp.lt.u32.totalorder %s1530_s28, %s1526_s18  ;;  %p1534_p3 = scmp.lt.u32.totalorder %s1526_s18, %s1992_s30 }
 0x23f   : > { %p1528_p7 = pnand %p1527_p6, %p2069_p12 }
 0x240   : > { %p1533_p10 = por %p1532_p1, %p1531_p8 }
 0x241   : > { %p1529_p2 = pneg %p1528_p7 }
 0x242   : > { %p1535_p5 = por %p1534_p3, %p1533_p10 }
 0x244   : > { %p1536_p9 = pnand %p1535_p5, %p1529_p2 }
 0x246   : > { %1539 = shalt.err (!%p1536_p9)
}
 0x247   : > { %1294 = dma.vmem_to_hbm [thread:$0]  (%p2069_p12), %s1985_s8, 256, %s1992_s30, %s961_s14, %s1615_s9, %s1615_s9, %s1616_s11  }
 0x248 PF: > { %s2070_s7 = sld [smem:[#allocation15_spill]]  ;;  %s1012_s29 = sand.u32 1, %s1582_s21  }
 0x249   : > { %p2072_p0 = scmp.ge.s32.totalorder %s1602_s26, 2  ;;  %s1013_s20 = scalar_lea.sflag [#allocation4], %s1012_s29 }
 0x24e   : > { %p2071_p11 = scmp.ne.s32.totalorder %s2070_s7, 0 }
 0x250   : > { %p1310_p4 = pnand %p2072_p0, %p2071_p11 }
 0x252   : > { %1573 = dma.done.wait (!%p1310_p4), %s1013_s20, 256  }
 0x253   : > { %1575 = vsyncadd (!%p1310_p4), %s1013_s20, 4294967040  ;;  %s1022_s12 = scalar_lea.sflag [#allocation10], %s1012_s29 }
 0x254   : > { %1577 = dma.done.wait (!%p1310_p4), %s1022_s12, 256  }
 0x255   : > { %1579 = vsyncadd (!%p1310_p4), %s1022_s12, 4294967040  ;;  %s27_s26 = sadd.s32 1, %s1602_s26   ;;  %s2073_s21 = smov %s1586_s22 }
 0x256   : > { %p24_p13 = scmp.ge.s32.totalorder %s27_s26, 4   ;;  %s2074_s22 = smov %s1590_s23 }
 0x257   : > { %s2075_s23 = smov %s1795_s13  ;;  %s2076_s24 = smov %s1598_s25 }
 0x258   : > { %s2077_s25 = smov %s2079_s16  ;;  %26 = sbr.rel (!%p24_p13) target bundleno = 9 (0x9), region = 116 }
 0x25f   :  { %1027 = vsyncpa [#allocation3], 1 }
 0x260   :  { %1029 = vsyncpa [#allocation3 + $0x1], 1 }
 0x261   :  { %1030 = vsyncpa [#allocation6], 1 }
 0x262   :  { %1031 = vsyncpa [#allocation4], 1 }
 0x263   :  { %1033 = vsyncpa [#allocation4 + $0x1], 1 }
 0x264   :  { %1034 = vsyncpa [#allocation10], 1 }
 0x265   :  { %1036 = vsyncpa [#allocation10 + $0x1], 1 }

// kernel: tpu_custom_call.1
= control target key start
LH: loop header
LB: loop body
LE: loop exit
PB: predicated region body
PF: predicated region fallthrough
CT: control target
= control target key end

     0   :  { %12 = vsyncpa [#allocation3], 0  ;;  %s2046_s0 = inlined_call_operand.hbm [shape: f32[2,8,32], index: 0, kind: input, shape index: {}]   ;;  %s2047_s1 = inlined_call_operand.hbm [shape: bf16[32,32], index: 1, kind: input, shape index: {}]   ;;  %s2048_s2 = inlined_call_operand.vmem [shape: f32[1,32], index: 2, kind: input, shape index: {}]   ;;  %s2049_s3 = inlined_call_operand.hbm [shape: bf16[32,32], index: 3, kind: input, shape index: {}]   ;;  %s2050_s4 = inlined_call_operand.vmem [shape: f32[1,32], index: 4, kind: input, shape index: {}]   ;;  %s2051_s5 = inlined_call_operand.hbm [shape: bf16[2,4,8,8], index: 5, kind: output, shape index: {0}]   ;;  %s2052_s6 = inlined_call_operand.hbm [shape: bf16[2,4,8,8], index: 6, kind: output, shape index: {1}]  }
   0x1   :  { %14 = vsyncpa [#allocation3 + $0x1], 0 }
   0x2   :  { %15 = vsyncpa [#allocation6], 0 }
   0x3   :  { %16 = vsyncpa [#allocation4], 0 }
   0x4   :  { %18 = vsyncpa [#allocation4 + $0x1], 0 }
   0x5   :  { %19 = vsyncpa [#allocation10], 0 }
   0x6   :  { %21 = vsyncpa [#allocation10 + $0x1], 0  ;;  %s1653_s21 = smov 0   ;;  %s1655_s22 = smov 0  }
   0x7   :  { %s1657_s23 = smov 0   ;;  %s1659_s24 = smov 0  }
   0x8   :  { %s1661_s25 = smov 0   ;;  %s1663_s26 = smov 0  }
   0x9 LB: > { %s1134_s27 = sadd.s32 4294967295, %s1602_s26   ;;  %s1135_s28 = sadd.s32 4294967294, %s1602_s26   ;;  %s1602_s26 = sphi %s1663_s26, %s27_s26   ;;  %s1598_s25 = sphi %s1661_s25, %s2077_s25   ;;  %s1594_s24 = sphi %s1659_s24, %s2076_s24   ;;  %s1590_s23 = sphi %s1657_s23, %s2075_s23   ;;  %s1586_s22 = sphi %s1655_s22, %s2074_s22   ;;  %s1582_s21 = sphi %s1653_s21, %s2073_s21  }
   0xa   : > { %p61_p0 = scmp.ne.s32.totalorder %s1586_s22, %s1582_s21  ;;  %p1687_p1 = scmp.eq.s32.totalorder %s1134_s27, 0 }
   0xb   : > { %p1691_p2 = scmp.eq.s32.totalorder %s1134_s27, 1  ;;  %p177_p3 = scmp.eq.s32.totalorder %s1135_s28, 1 }
   0xc   : > { %s2058_s29 = scalar_select %p1687_p1, 1, 0 }
   0xd   : > { %p1697_p4 = por %p1687_p1, %p61_p0  ;;  %p1136_p5 = scmp.ge.s32.totalorder %s1602_s26, 1 }
   0xe   : > { %p1702_p6 = por %p177_p3, %p61_p0  ;;  %p212_p7 = scmp.lt.s32.totalorder %s1602_s26, 3 }
   0xf   : > { %s2060_s7 = scalar_select %p1697_p4, 1, 0 }
  0x10   : > { %s2061_s8 = scalar_select %p1702_p6, 1, 0 }
  0x11   : > { %p1707_p8 = pnand %p1136_p5, %p212_p7  ;;  %s1604_s10 = smov [#allocation5]  }
  0x12   : > { %2062 = sst [smem:[#allocation15_spill]] %s2061_s8  ;;  %s224_s11 = sshll.u32 %s1604_s10, 4  ;;  %s1711_s11 = int_to_ptr.vmem [resolvable:$true] %s224_s11 }
  0x13   : > { %p1298_p9 = pneg %p1707_p8  ;;  %s1605_s13 = smov [#allocation7]  }
  0x14   : > { %s240_s14 = sshll.u32 %s1605_s13, 4  ;;  %s1398_s17 = scalar_lea.hbm %s2047_s1, 256  ;;  %s1722_s14 = int_to_ptr.vmem [resolvable:$true] %s240_s14 }
  0x15   : > { %p1718_p11 = pnand %p1298_p9, %p1687_p1  ;;  %p1399_p12 = scmp.ne.s32.totalorder %s2047_s1, %s1398_s17 }
  0x16   : > { %p1405_p5 = scmp.lt.u32.totalorder %s1398_s17, %s2047_s1 }
  0x17   : > { %p1400_p13 = pneg %p1718_p11 }
  0x19   : > { %p1401_p0 = pnand %p1400_p13, %p1399_p12 }
  0x1b   : > { %p1402_p3 = pneg %p1401_p0 }
  0x1d   : > { %p1407_p7 = pnand %p1405_p5, %p1402_p3 }
  0x1f   : > { %1410 = shalt.err (!%p1407_p7)
}
  0x20   : > { %s1411_s28 = scalar_lea.vmem %s1711_s11, 256  ;;  %p1419_p1 = scmp.lt.s32.totalorder %s1711_s11, %s1711_s11 }
  0x21   : > { %p1412_p9 = scmp.ne.s32.totalorder %s1711_s11, %s1411_s28  ;;  %p1420_p12 = scmp.lt.s32.totalorder %s1411_s28, %s1411_s28 }
  0x23   : > { %p1414_p10 = pnand %p1412_p9, %p1400_p13  ;;  %p1421_p0 = por %p1420_p12, %p1419_p1 }
  0x25   : > { %p1415_p6 = pneg %p1414_p10 }
  0x27   : > { %p1422_p4 = pnand %p1421_p0, %p1415_p6 }
  0x29   : > { %1425 = shalt.err (!%p1422_p4)
}
  0x2a   : > { %s1606_s10 = smov 64   ;;  %s1607_s13 = smov 4  }
  0x2b   : > { %1301 = dma.hbm_to_vmem [thread:$0]  (!%p1718_p11), %s2047_s1, 256, %s1711_s11, [#allocation6], %s1606_s10, %s1606_s10, %s1607_s13  }
  0x2c   : > { %s1426_s19 = scalar_lea.hbm %s2049_s3, 256 }
  0x2d   : > { %p1427_p1 = scmp.ne.s32.totalorder %s2049_s3, %s1426_s19  ;;  %p1433_p10 = scmp.lt.u32.totalorder %s1426_s19, %s2049_s3 }
  0x2f   : > { %p1429_p4 = pnand %p1427_p1, %p1400_p13 }
  0x31   : > { %p1430_p6 = pneg %p1429_p4 }
  0x33   : > { %p1435_p3 = pnand %p1433_p10, %p1430_p6 }
  0x35   : > { %1438 = shalt.err (!%p1435_p3)
}
  0x36   : > { %s1439_s11 = scalar_lea.vmem %s1722_s14, 256  ;;  %p1447_p12 = scmp.lt.s32.totalorder %s1722_s14, %s1722_s14 }
  0x37   : > { %p1440_p5 = scmp.ne.s32.totalorder %s1722_s14, %s1439_s11  ;;  %p1448_p0 = scmp.lt.s32.totalorder %s1439_s11, %s1439_s11 }
  0x39   : > { %p1442_p7 = pnand %p1440_p5, %p1400_p13  ;;  %p1449_p1 = por %p1448_p0, %p1447_p12 }
  0x3b   : > { %p1443_p9 = pneg %p1442_p7 }
  0x3d   : > { %p1450_p4 = pnand %p1449_p1, %p1443_p9 }
  0x3f   : > { %1453 = shalt.err (!%p1450_p4)
}
  0x40   : > { %1304 = dma.hbm_to_vmem [thread:$0]  (!%p1718_p11), %s2049_s3, 256, %s1722_s14, [#allocation6], %s1606_s10, %s1606_s10, %s1607_s13  }
  0x41   : > { %s39_s16 = sadd.s32 1, %s1598_s25  ;;  %s48_s17 = sadd.s32 1, %s1590_s23 }
  0x42   : > { %p41_p13 = scmp.ge.s32.totalorder %s39_s16, 2  ;;  %p55_p6 = scmp.ne.s32.totalorder %s1590_s23, %s1586_s22 }
  0x43   : > { %p56_p10 = scmp.eq.s32.totalorder %s1602_s26, 0  ;;  %p1318_p3 = scmp.lt.s32.totalorder %s1602_s26, 2 }
  0x44   : > { %s2079_s16 = smov (%p41_p13, %s39_s16), 0  ;;  %p1786_p7 = por %p1691_p2, %p55_p6 }
  0x45   : > { %p57_p5 = por %p56_p10, %p55_p6  ;;  %s43_s18 = ssub.s32 %s1598_s25, %s2079_s16 }
  0x46   : > { %s2065_s12 = scalar_select %p1786_p7, 1, 0 }
  0x47   : > { %s257_s19 = sand.u32 1, %s1590_s23   ;;  %p46_p9 = scmp.eq.s32.totalorder %s43_s18, 0 }
  0x48   : > { %s1140_s14 = sshll.u32 %s257_s19, 3  ;;  %s1141_s10 = sshll.u32 %s1598_s25, 7 }
  0x49   : > { %s1795_s13 = scalar_select %p46_p9, %s1590_s23, %s48_s17  }
  0x4a   : > { %s1800_s28 = scalar_lea.hbm %s2046_s0, %s1141_s10  ;;  %s261_s30 = scalar_lea.vmem [#allocation2], %s1140_s14 }
  0x4b   : > { %s269_s11 = sshll.u32 %s261_s30, 4  ;;  %p1804_p2 = pnand %p1318_p3, %p57_p5  ;;  %s1808_s11 = int_to_ptr.vmem [resolvable:$true] %s269_s11 }
  0x4c   : > { %s258_s15 = scalar_lea.sflag [#allocation3], %s257_s19  ;;  %s1454_s17 = scalar_lea.hbm %s1800_s28, 128 }
  0x4d   : > { %p1455_p11 = scmp.ne.s32.totalorder %s1800_s28, %s1454_s17  ;;  %p1456_p12 = pneg %p1804_p2 }
  0x4e   : > { %s1459_s10 = scalar_lea.hbm %s2046_s0, 256  ;;  %p1460_p4 = scmp.lt.u32.totalorder %s1800_s28, %s2046_s0 }
  0x4f   : > { %p1457_p0 = pnand %p1456_p12, %p1455_p11  ;;  %p1461_p13 = scmp.lt.u32.totalorder %s1459_s10, %s1454_s17 }
  0x50   : > { %p1463_p10 = scmp.lt.u32.totalorder %s1454_s17, %s1800_s28 }
  0x51   : > { %p1458_p1 = pneg %p1457_p0  ;;  %p1462_p6 = por %p1461_p13, %p1460_p4 }
  0x53   : > { %p1464_p3 = por %p1463_p10, %p1462_p6 }
  0x55   : > { %p1465_p5 = pnand %p1464_p3, %p1458_p1 }
  0x57   : > { %1468 = shalt.err (!%p1465_p5)
}
  0x58   : > { %s1469_s19 = scalar_lea.vmem %s1808_s11, 128  ;;  %s1608_s30 = smov [#allocation2]  }
  0x59   : > { %p1470_p9 = scmp.ne.s32.totalorder %s1808_s11, %s1469_s19  ;;  %s1474_s18 = sshll.u32 %s1608_s30, 4  ;;  %s1475_s18 = int_to_ptr.vmem [resolvable:$false] %s1474_s18 }
  0x5a   : > { %s1476_s14 = scalar_lea.vmem %s1475_s18, 256  ;;  %p1477_p7 = scmp.lt.s32.totalorder %s1808_s11, %s1475_s18 }
  0x5b   : > { %p1472_p11 = pnand %p1470_p9, %p1456_p12  ;;  %p1478_p4 = scmp.lt.s32.totalorder %s1476_s14, %s1469_s19 }
  0x5d   : > { %p1473_p0 = pneg %p1472_p11  ;;  %p1479_p13 = por %p1478_p4, %p1477_p7 }
  0x5f   : > { %p1480_p6 = pnand %p1479_p13, %p1473_p0 }
  0x61   : > { %1483 = shalt.err (!%p1480_p6)
}
  0x62   : > { %1308 = dma.hbm_to_vmem [thread:$0]  (!%p1804_p2), %s1800_s28, 128, %s1808_s11, %s258_s15  }
  0x63   : > { %278 = sbr.rel (%p1707_p8) target bundleno = 584 (0x248), region = 40  ;;  %s1838_s17 = sand.u32 (!%p1707_p8), 1, %s1586_s22  }
  0x64   : > { %s1143_s10 = sshll.u32 (!%p1707_p8), %s1838_s17, 3  ;;  %s281_s20 = scalar_lea.sflag (!%p1707_p8), [#allocation3], %s1838_s17 }
  0x65   : > { %s1842_s27 = scalar_lea.vmem (!%p1707_p8), [#allocation2], %s1143_s10  ;;  %p2067_p7 = scmp.ne.s32.totalorder (!%p1707_p8), %s2060_s7, 0 }
  0x6a   : > { %1565 = dma.done.wait (%p2067_p7), %s281_s20, 128  }
  0x6b   : > { %1567 = vsyncadd (%p2067_p7), %s281_s20, 4294967168  ;;  %p2068_p2 = scmp.ne.s32.totalorder %s2058_s29, 0 }
  0x6d   : > { %1569 = dma.done.wait (%p2068_p2), [#allocation6], 512  }
  0x6e   : > { %1571 = vsyncadd (%p2068_p2), [#allocation6], 4294966784  ;;  %v1609_v0 = vmov 0.0   ;;  %vm1610_vm0 = vmmov 0   ;;  %v1382_v1 = vld [vmem:[#allocation5] sm:$0xff]   ;;  %v1383_v2 = vld [vmem:[#allocation5 + $0x8] sm:$0xff]  }
  0x6f   : > { %1220 = vmatprep.subr.bf16.mxu0 %v1609_v0  ;;  %1224 = vmatprep.mubr.msk.bf16.mxu0 %vm1610_vm0, %v1609_v0  ;;  %s1611_s7 = smov 120   ;;  %v1384_v3 = vld [vmem:[#allocation5] sm:$0xff]   ;;  %s1612_s29 = smov 112   ;;  %v1385_v4 = vld [vmem:[#allocation5 + $0x8] sm:$0xff]   ;;  %v1388_v7 = vld [vmem:[#allocation7] sm:$0xff]   ;;  %vm352_vm1 = vcmask 261120  }
  0x70   : > { %1228 = vmatprep.subr.bf16.mxu1 %v1609_v0  ;;  %1232 = vmatprep.mubr.msk.bf16.mxu1 %vm1610_vm0, %v1609_v0  ;;  %v1386_v5 = vld [vmem:[#allocation5] sm:$0xff]   ;;  %v1387_v6 = vld [vmem:[#allocation5 + $0x8] sm:$0xff]   ;;  %s1613_s9 = smov 104   ;;  %v1389_v8 = vld [vmem:[#allocation7 + $0x8] sm:$0xff]   ;;  %s1146_s19 = sshll.u32 %s1838_s17, 4  ;;  %vm476_vm2 = vcmask 60416  }
  0x71   : > { %500 = vrot.lane.b32.xlu0 %v1382_v1, %s1611_s7  ;;  %660 = vrot.lane.b32.xlu1 %v1384_v3, %s1612_s29  ;;  %v1390_v9 = vld [vmem:[#allocation7] sm:$0xff]   ;;  %v1394_v10 = vld [vmem:[#allocation5] sm:$0xff]   ;;  %v1395_v11 = vld [vmem:[#allocation5 + $0x8] sm:$0xff]   ;;  %s1928_s30 = scalar_lea.vmem [#allocation9], %s1146_s19  ;;  %s1932_s18 = scalar_lea.vmem [#allocation8], %s1146_s19 }
  0x72   : > { %1221 = vmatpush3.bf16.msra.mxu0 %v1394_v10  ;;  %v327_v12 = vld [vmem:[%s1842_s27] sm:$0xff]  ;;  %s997_s14 = sshll.u32 %s1928_s30, 4  ;;  %s1194_s10 = sshll.u32 %s1594_s24, 8  ;;  %s1942_s14 = int_to_ptr.vmem [resolvable:$true] %s997_s14 }
  0x73   : > { %1222 = vmatprep.subr.bf16.mxu0 %v1609_v0  ;;  %v1396_v13 = vld [vmem:[#allocation7] sm:$0xff]   ;;  %v1391_v14 = vld [vmem:[#allocation7 + $0x8] sm:$0xff]   ;;  %v1868_v15 = vpack.c.bf16 %v327_v12, %v327_v12  ;;  %p2069_p12 = scmp.ne.s32.totalorder %s2065_s12, 0  ;;  %s1614_s28 = smov [#allocation9]  }
  0x74   : > { %1229 = vmatpush3.bf16.msra.mxu1 %v1396_v13  ;;  %v1397_v16 = vld [vmem:[#allocation7 + $0x8] sm:$0xff]   ;;  %v1392_v17 = vld [vmem:[#allocation7] sm:$0xff]   ;;  %s1488_s11 = sshll.u32 %s1614_s28, 4  ;;  %s1489_s11 = int_to_ptr.vmem [resolvable:$false] %s1488_s11 }
  0x75   : > { %502 = vrot.lane.b32.xlu0 %v1383_v2, %s1611_s7  ;;  %662 = vrot.lane.b32.xlu1 %v1385_v4, %s1612_s29  ;;  %v1393_v18 = vld [vmem:[#allocation7 + $0x8] sm:$0xff]   ;;  %v1156_v19 = vld [vmem:[%s2048_s2] ss:$0 sm:$0xff]  ;;  %s1490_s8 = scalar_lea.vmem %s1489_s11, 512  ;;  %p1491_p3 = scmp.lt.s32.totalorder %s1942_s14, %s1489_s11 }
  0x76   : > { %1223 = vmatpush3.bf16.msra.mxu0 %v1395_v11  ;;  %1230 = vmatprep.subr.bf16.mxu1 %v1609_v0  ;;  %v1160_v20 = vld [vmem:[%s2050_s4] ss:$0 sm:$0xff] }
  0x77   : > { %1236 = vmatprep.subr.bf16.mxu0 %v1609_v0 }
  0x78   : > { %1231 = vmatpush3.bf16.msra.mxu1 %v1397_v16 }
  0x79   : > { %820 = vrot.lane.b32.xlu0 %v1386_v5, %s1613_s9  ;;  %822 = vrot.lane.b32.xlu1 %v1387_v6, %s1613_s9 }
  0x7a   : > { %1225 = vmatmul.mubr.msk.bf16.vlgmr.msra.gmra.mrb[0].mxu0 %vm352_vm1, %v1868_v15  ;;  %1244 = vmatprep.subr.bf16.mxu1 %v1609_v0 }
  0x7b   : > { %1240 = vmatprep.mubr.msk.bf16.mxu0 %vm1610_vm0, %v1609_v0  ;;  %1233 = vmatmul.mubr.msk.bf16.vlgmr.msra.gmra.mrb[0].mxu1 %vm352_vm1, %v1868_v15 }
  0x7c   : > { %1248 = vmatprep.mubr.msk.bf16.mxu1 %vm1610_vm0, %v1609_v0 }
  0x7d   : > { %569 = vrot.lane.b32.xlu0 %v1388_v7, %s1611_s7  ;;  %571 = vrot.lane.b32.xlu1 %v1389_v8, %s1611_s7 }
  0x81   : > { %729 = vrot.lane.b32.xlu0 %v1390_v9, %s1612_s29  ;;  %731 = vrot.lane.b32.xlu1 %v1391_v14, %s1612_s29 }
  0x85   : > { %889 = vrot.lane.b32.xlu0 %v1392_v17, %s1613_s9  ;;  %891 = vrot.lane.b32.xlu1 %v1393_v18, %s1613_s9 }
  0x89   : > { %506 = vrot.lane.b32.xlu0 %v1156_v19, %s1611_s7  ;;  %666 = vrot.lane.b32.xlu1 %v1156_v19, %s1612_s29 }
  0x8d   : > { %826 = vrot.lane.b32.xlu0 %v1156_v19, %s1613_s9  ;;  %575 = vrot.lane.b32.xlu1 %v1160_v20, %s1611_s7  ;;  %s1949_s7 = scalar_lea.hbm %s2052_s6, %s1194_s10 }
  0x91   : > { %735 = vrot.lane.b32.xlu0 %v1160_v20, %s1612_s29  ;;  %895 = vrot.lane.b32.xlu1 %v1160_v20, %s1613_s9  ;;  %s966_s29 = scalar_lea.sflag [#allocation10], %s1838_s17  ;;  %s1484_s9 = scalar_lea.vmem %s1942_s14, 256 }
  0x92   : > { %p1485_p8 = scmp.ne.s32.totalorder %s1942_s14, %s1484_s9  ;;  %p1492_p5 = scmp.lt.s32.totalorder %s1490_s8, %s1484_s9 }
  0x94   : > { %p1486_p1 = pnand %p1485_p8, %p2069_p12  ;;  %p1493_p9 = por %p1492_p5, %p1491_p3 }
  0x96   : > { %p1487_p10 = pneg %p1486_p1 }
  0x98   : > { %p1494_p11 = pnand %p1493_p9, %p1487_p10 }
  0xe3   : > { %v501_v21 = vpop.permute.xlu0 %500  ;;  %v661_v22 = vpop.permute.xlu1 %660 }
  0xe4   : > { %1237 = vmatpush3.bf16.msra.mxu0 %v501_v21 }
  0xe5   : > { %1238 = vmatprep.subr.bf16.mxu0 %v1609_v0 }
  0xe7   : > { %v503_v23 = vpop.permute.xlu0 %502  ;;  %v663_v24 = vpop.permute.xlu1 %662 }
  0xe8   : > { %1239 = vmatpush3.bf16.msra.mxu0 %v503_v23 }
  0xe9   : > { %1252 = vmatprep.subr.bf16.mxu0 %v1609_v0 }
  0xeb   : > { %1241 = vmatmul.mubr.msk.bf16.vlgmr.msra.gmra.mrb[4].mxu0 %vm352_vm1, %v1868_v15  ;;  %v821_v25 = vpop.permute.xlu0 %820  ;;  %v823_v26 = vpop.permute.xlu1 %822 }
  0xec   : > { %1253 = vmatpush3.bf16.msra.mxu0 %v661_v22  ;;  %1256 = vmatprep.mubr.msk.bf16.mxu0 %vm1610_vm0, %v1609_v0 }
  0xed   : > { %1254 = vmatprep.subr.bf16.mxu0 %v1609_v0 }
  0xef   : > { %v570_v27 = vpop.permute.xlu0 %569  ;;  %v572_v28 = vpop.permute.xlu1 %571 }
  0xf0   : > { %1255 = vmatpush3.bf16.msra.mxu0 %v663_v24  ;;  %1245 = vmatpush3.bf16.msra.mxu1 %v570_v27 }
  0xf1   : > { %1268 = vmatprep.subr.bf16.mxu0 %v1609_v0  ;;  %1246 = vmatprep.subr.bf16.mxu1 %v1609_v0 }
  0xf3   : > { %1257 = vmatmul.mubr.msk.bf16.vlgmr.msra.gmra.mrb[8].mxu0 %vm352_vm1, %v1868_v15  ;;  %v730_v29 = vpop.permute.xlu0 %729  ;;  %v732_v30 = vpop.permute.xlu1 %731 }
  0xf4   : > { %1269 = vmatpush3.bf16.msra.mxu0 %v821_v25  ;;  %1272 = vmatprep.mubr.msk.bf16.mxu0 %vm1610_vm0, %v1609_v0 }
  0xf5   : > { %1270 = vmatprep.subr.bf16.mxu0 %v1609_v0  ;;  %1247 = vmatpush3.bf16.msra.mxu1 %v572_v28 }
  0xf6   : > { %1260 = vmatprep.subr.bf16.mxu1 %v1609_v0 }
  0xf7   : > { %v890_v31 = vpop.permute.xlu0 %889  ;;  %v892_v32 = vpop.permute.xlu1 %891 }
  0xf8   : > { %1271 = vmatpush3.bf16.msra.mxu0 %v823_v26  ;;  %1249 = vmatmul.mubr.msk.bf16.vlgmr.msra.gmra.mrb[4].mxu1 %vm352_vm1, %v1868_v15 }
  0xf9   : > { %1261 = vmatpush3.bf16.msra.mxu1 %v730_v29  ;;  %1264 = vmatprep.mubr.msk.bf16.mxu1 %vm1610_vm0, %v1609_v0 }
  0xfa   : > { %1262 = vmatprep.subr.bf16.mxu1 %v1609_v0 }
  0xfb   : > { %1273 = vmatmul.mubr.msk.bf16.vlgmr.msra.gmra.mrb[12].mxu0 %vm352_vm1, %v1868_v15  ;;  %v507_v45 = vpop.permute.xlu0 %506  ;;  %v667_v55 = vpop.permute.xlu1 %666 }
  0xfd   : > { %1263 = vmatpush3.bf16.msra.mxu1 %v732_v30 }
  0xfe   : > { %1276 = vmatprep.subr.bf16.mxu1 %v1609_v0 }
  0xff   : > { %v827_v46 = vpop.permute.xlu0 %826  ;;  %v576_v62 = vpop.permute.xlu1 %575 }
 0x100   : > { %1265 = vmatmul.mubr.msk.bf16.vlgmr.msra.gmra.mrb[8].mxu1 %vm352_vm1, %v1868_v15 }
 0x101   : > { %1277 = vmatpush3.bf16.msra.mxu1 %v890_v31  ;;  %1280 = vmatprep.mubr.msk.bf16.mxu1 %vm1610_vm0, %v1609_v0 }
 0x102   : > { %1278 = vmatprep.subr.bf16.mxu1 %v1609_v0 }
 0x103   : > { %v736_v48 = vpop.permute.xlu0 %735  ;;  %v896_v17 = vpop.permute.xlu1 %895 }
 0x105   : > { %1279 = vmatpush3.bf16.msra.mxu1 %v892_v32 }
 0x108   : > { %1281 = vmatmul.mubr.msk.bf16.vlgmr.msra.gmra.mrb[12].mxu1 %vm352_vm1, %v1868_v15 }
 0x14d   : > { %v390_v33 = vpop.f32.mrb[0].mxu0 }
 0x14e   : > { %v391_v34 = vadd.f32 %v1156_v19, %v390_v33  ;;  %v1226_v35 = vpop.f32.mrb[1].mxu0  ;;  %v453_v39 = vpop.f32.mrb[0].mxu1 }
 0x14f   : > { %v393_v36 = vpop.f32.mrb[2].mxu0  ;;  %v454_v40 = vadd.f32 %v1160_v20, %v453_v39  ;;  %v1234_v41 = vpop.f32.mrb[1].mxu1 }
 0x150   : > { %v459_v37 = vpack.c.bf16 %v391_v34, %v391_v34  ;;  %v1227_v38 = vpop.f32.mrb[3].mxu0  ;;  %v456_v42 = vpop.f32.mrb[2].mxu1 }
 0x151   : > { %v478_v43 = vpack.c.bf16 %v454_v40, %v454_v40  ;;  %v1235_v44 = vpop.f32.mrb[3].mxu1 }
 0x152   : > { %460 = vxpose.xlu0.c.b16.start.end [1/1] (short) (narrow) %v459_v37, 16 }
 0x153   : > { %479 = vst.msk [vmem:[%s1928_s30] sm:$0xf] %vm476_vm2, %v478_v43 }
 0x1b8   : > { %v468_v54 = vpop.trf.xlu0 }
 0x1b9   : > { %477 = vst.msk [vmem:[%s1932_s18] sm:$0xf] %vm476_vm2, %v468_v54 }
 0x1be   : > { %v543_v47 = vpop.f32.mrb[4].mxu0 }
 0x1bf   : > { %v544_v49 = vadd.f32 %v543_v47, %v507_v45  ;;  %v1242_v50 = vpop.f32.mrb[5].mxu0 }
 0x1c0   : > { %v546_v51 = vpop.f32.mrb[6].mxu0 }
 0x1c1   : > { %v618_v52 = vpack.c.bf16 %v544_v49, %v544_v49  ;;  %v1243_v53 = vpop.f32.mrb[7].mxu0 }
 0x1c3   : > { %619 = vxpose.xlu1.c.b16.start.end [1/1] (short) (narrow) %v618_v52, 16 }
 0x1c6   : > { %v703_v56 = vpop.f32.mrb[8].mxu0 }
 0x1c7   : > { %v704_v57 = vadd.f32 %v703_v56, %v667_v55  ;;  %v1258_v58 = vpop.f32.mrb[9].mxu0 }
 0x1c8   : > { %v706_v59 = vpop.f32.mrb[10].mxu0 }
 0x1c9   : > { %v778_v60 = vpack.c.bf16 %v704_v57, %v704_v57  ;;  %v1259_v61 = vpop.f32.mrb[11].mxu0 }
 0x1cb   : > { %779 = vxpose.xlu0.c.b16.start.end [1/1] (short) (narrow) %v778_v60, 16  ;;  %v612_v63 = vpop.f32.mrb[4].mxu1 }
 0x1cc   : > { %v1250_v0 = vpop.f32.mrb[5].mxu1  ;;  %v613_v1 = vadd.f32 %v612_v63, %v576_v62 }
 0x1cd   : > { %v615_v2 = vpop.f32.mrb[6].mxu1 }
 0x1ce   : > { %v863_v3 = vpop.f32.mrb[12].mxu0  ;;  %v1251_v4 = vpop.f32.mrb[7].mxu1  ;;  %v637_v5 = vpack.c.bf16 %v613_v1, %v613_v1 }
 0x1cf   : > { %v864_v6 = vadd.f32 %v863_v3, %v827_v46  ;;  %v1274_v7 = vpop.f32.mrb[13].mxu0 }
 0x1d0   : > { %v866_v8 = vpop.f32.mrb[14].mxu0  ;;  %1165 = vst.msk [vmem:[%s1928_s30 + $0x4] sm:$0xf] %vm476_vm2, %v637_v5 }
 0x1d1   : > { %v938_v9 = vpack.c.bf16 %v864_v6, %v864_v6  ;;  %v1275_v10 = vpop.f32.mrb[15].mxu0 }
 0x1d3   : > { %939 = vxpose.xlu0.c.b16.start.end [1/1] (short) (narrow) %v938_v9, 16  ;;  %v772_v11 = vpop.f32.mrb[8].mxu1 }
 0x1d4   : > { %v773_v12 = vadd.f32 %v772_v11, %v736_v48  ;;  %v1266_v13 = vpop.f32.mrb[9].mxu1 }
 0x1d5   : > { %v775_v14 = vpop.f32.mrb[10].mxu1 }
 0x1d6   : > { %v797_v15 = vpack.c.bf16 %v773_v12, %v773_v12  ;;  %v1267_v16 = vpop.f32.mrb[11].mxu1 }
 0x1d8   : > { %1175 = vst.msk [vmem:[%s1928_s30 + $0x8] sm:$0xf] %vm476_vm2, %v797_v15 }
 0x1db   : > { %v932_v18 = vpop.f32.mrb[12].mxu1 }
 0x1dc   : > { %v933_v19 = vadd.f32 %v932_v18, %v896_v17  ;;  %v1282_v20 = vpop.f32.mrb[13].mxu1 }
 0x1dd   : > { %v935_v21 = vpop.f32.mrb[14].mxu1 }
 0x1de   : > { %v957_v22 = vpack.c.bf16 %v933_v19, %v933_v19  ;;  %v1283_v23 = vpop.f32.mrb[15].mxu1 }
 0x1e0   : > { %1185 = vst.msk [vmem:[%s1928_s30 + $0xc] sm:$0xf] %vm476_vm2, %v957_v22 }
 0x1e1   : > { %1497 = shalt.err (!%p1494_p11)
}
 0x1e2   : > { %s1498_s15 = scalar_lea.hbm %s1949_s7, 256  ;;  %s1502_s20 = scalar_lea.hbm %s2052_s6, 512 }
 0x1e3   : > { %p1499_p0 = scmp.ne.s32.totalorder %s1949_s7, %s1498_s15  ;;  %p1503_p6 = scmp.lt.u32.totalorder %s1949_s7, %s2052_s6 }
 0x1e4   : > { %p1504_p7 = scmp.lt.u32.totalorder %s1502_s20, %s1498_s15  ;;  %p1506_p8 = scmp.lt.u32.totalorder %s1498_s15, %s1949_s7 }
 0x1e5   : > { %p1500_p4 = pnand %p1499_p0, %p2069_p12 }
 0x1e6   : > { %p1505_p2 = por %p1504_p7, %p1503_p6 }
 0x1e7   : > { %p1501_p13 = pneg %p1500_p4 }
 0x1e8   : > { %p1507_p1 = por %p1506_p8, %p1505_p2 }
 0x1ea   : > { %p1508_p10 = pnand %p1507_p1, %p1501_p13 }
 0x1ec   : > { %1511 = shalt.err (!%p1508_p10)
}
 0x1ed   : > { %s1615_s9 = smov 64   ;;  %s1616_s11 = smov 4  }
 0x1ee   : > { %1295 = dma.vmem_to_hbm [thread:$0]  (%p2069_p12), %s1942_s14, 256, %s1949_s7, %s966_s29, %s1615_s9, %s1615_s9, %s1616_s11  }
 0x1ef   : > { %s980_s8 = sshll.u32 %s1932_s18, 4  ;;  %s1992_s30 = scalar_lea.hbm %s2051_s5, %s1194_s10  ;;  %s1985_s8 = int_to_ptr.vmem [resolvable:$true] %s980_s8 }
 0x1f0   : > { %s961_s14 = scalar_lea.sflag [#allocation4], %s1838_s17  ;;  %s1512_s7 = scalar_lea.vmem %s1985_s8, 256 }
 0x1f1   : > { %p1513_p3 = scmp.ne.s32.totalorder %s1985_s8, %s1512_s7  ;;  %s1617_s29 = smov [#allocation8]  }
 0x1f2   : > { %s1516_s20 = sshll.u32 %s1617_s29, 4  ;;  %s1517_s20 = int_to_ptr.vmem [resolvable:$false] %s1516_s20 }
 0x1f3   : > { %p1514_p5 = pnand %p1513_p3, %p2069_p12  ;;  %s1518_s24 = scalar_lea.vmem %s1517_s20, 512 }
 0x1f4   : > { %p1519_p11 = scmp.lt.s32.totalorder %s1985_s8, %s1517_s20  ;;  %p1520_p0 = scmp.lt.s32.totalorder %s1518_s24, %s1512_s7 }
 0x1f5   : > { %p1515_p9 = pneg %p1514_p5 }
 0x1f6   : > { %p1521_p4 = por %p1520_p0, %p1519_p11 }
 0x1f8   : > { %p1522_p13 = pnand %p1521_p4, %p1515_p9 }
 0x229   : > { %v627_v24 = vpop.trf.xlu1 }
 0x22a   : > { %1164 = vst.msk [vmem:[%s1932_s18 + $0x4] sm:$0xf] %vm476_vm2, %v627_v24 }
 0x231   : > { %v787_v25 = vpop.trf.xlu0 }
 0x232   : > { %1174 = vst.msk [vmem:[%s1932_s18 + $0x8] sm:$0xf] %vm476_vm2, %v787_v25 }
 0x239   : > { %v947_v26 = vpop.trf.xlu0 }
 0x23a   : > { %1184 = vst.msk [vmem:[%s1932_s18 + $0xc] sm:$0xf] %vm476_vm2, %v947_v26 }
 0x23b   : > { %1525 = shalt.err (!%p1522_p13)
}
 0x23c   : > { %s1526_s18 = scalar_lea.hbm %s1992_s30, 256  ;;  %s1530_s28 = scalar_lea.hbm %s2051_s5, 512 }
 0x23d   : > { %p1527_p6 = scmp.ne.s32.totalorder %s1992_s30, %s1526_s18  ;;  %p1531_p8 = scmp.lt.u32.totalorder %s1992_s30, %s2051_s5 }
 0x23e   : > { %p1532_p1 = scmp.lt.u32.totalorder %s1530_s28, %s1526_s18  ;;  %p1534_p3 = scmp.lt.u32.totalorder %s1526_s18, %s1992_s30 }
 0x23f   : > { %p1528_p7 = pnand %p1527_p6, %p2069_p12 }
 0x240   : > { %p1533_p10 = por %p1532_p1, %p1531_p8 }
 0x241   : > { %p1529_p2 = pneg %p1528_p7 }
 0x242   : > { %p1535_p5 = por %p1534_p3, %p1533_p10 }
 0x244   : > { %p1536_p9 = pnand %p1535_p5, %p1529_p2 }
 0x246   : > { %1539 = shalt.err (!%p1536_p9)
}
 0x247   : > { %1294 = dma.vmem_to_hbm [thread:$0]  (%p2069_p12), %s1985_s8, 256, %s1992_s30, %s961_s14, %s1615_s9, %s1615_s9, %s1616_s11  }
 0x248 PF: > { %s2070_s7 = sld [smem:[#allocation15_spill]]  ;;  %s1012_s29 = sand.u32 1, %s1582_s21  }
 0x249   : > { %p2072_p0 = scmp.ge.s32.totalorder %s1602_s26, 2  ;;  %s1013_s20 = scalar_lea.sflag [#allocation4], %s1012_s29 }
 0x24e   : > { %p2071_p11 = scmp.ne.s32.totalorder %s2070_s7, 0 }
 0x250   : > { %p1310_p4 = pnand %p2072_p0, %p2071_p11 }
 0x252   : > { %1573 = dma.done.wait (!%p1310_p4), %s1013_s20, 256  }
 0x253   : > { %1575 = vsyncadd (!%p1310_p4), %s1013_s20, 4294967040  ;;  %s1022_s12 = scalar_lea.sflag [#allocation10], %s1012_s29 }
 0x254   : > { %1577 = dma.done.wait (!%p1310_p4), %s1022_s12, 256  }
 0x255   : > { %1579 = vsyncadd (!%p1310_p4), %s1022_s12, 4294967040  ;;  %s27_s26 = sadd.s32 1, %s1602_s26   ;;  %s2073_s21 = smov %s1586_s22 }
 0x256   : > { %p24_p13 = scmp.ge.s32.totalorder %s27_s26, 4   ;;  %s2074_s22 = smov %s1590_s23 }
 0x257   : > { %s2075_s23 = smov %s1795_s13  ;;  %s2076_s24 = smov %s1598_s25 }
 0x258   : > { %s2077_s25 = smov %s2079_s16  ;;  %26 = sbr.rel (!%p24_p13) target bundleno = 9 (0x9), region = 116 }
 0x25f   :  { %1027 = vsyncpa [#allocation3], 1 }
 0x260   :  { %1029 = vsyncpa [#allocation3 + $0x1], 1 }
 0x261   :  { %1030 = vsyncpa [#allocation6], 1 }
 0x262   :  { %1031 = vsyncpa [#allocation4], 1 }
 0x263   :  { %1033 = vsyncpa [#allocation4 + $0x1], 1 }
 0x264   :  { %1034 = vsyncpa [#allocation10], 1 }
 0x265   :  { %1036 = vsyncpa [#allocation10 + $0x1], 1 }

</bundles_post_ra>
